<compile_context>
chip_gen: v7x
topology: tpu7x:2x2x1
jax: 0.10.0
libtpu: 0.0.40
codegen_flags: <defaults>
</compile_context>

<pallas_src>
import functools

import jax
import jax.numpy as jnp
from jax.experimental import pallas as pl
from jax.experimental.pallas import tpu as pltpu

FACTOR = 0.5
LANE = 128


def _round_up(x, m):
    return ((x + m - 1) // m) * m


def _fused_conv_kernel(x_ref, halo_ref, w_ref, b_ref, o_ref, xbuf_ref, *,
                       wp, tm, halo):
    # x_ref:    (1, TM, Cin)     bf16  current tile of the flat padded activation
    # halo_ref: (1, HALO, Cin)   bf16  first HALO rows of the *next* tile
    # w_ref:    (9, Cin, Npad)   bf16  fused per-tap weights (factor*3x3 + center 1x1)
    # b_ref:    (1, Npad)        f32   fused bias (factor*b3 + b1)
    # o_ref:    (TM, Npad)       f32   lane-dense virtual-output slab
    # xbuf_ref: (TM+HALO, Cin)   bf16  scratch: tile + bottom halo so every shifted
    #                                  tap window is one contiguous pl.ds load.
    xbuf_ref[pl.ds(0, tm), :] = x_ref[0]
    xbuf_ref[pl.ds(tm, halo), :] = halo_ref[0]

    acc = jnp.zeros(o_ref.shape, jnp.float32)
    # Unrolled 9-tap contraction: in-kernel im2col, 9 MXU pushes, f32 accumulate.
    for t in range(9):
        s = (t // 3) * wp + (t % 3)          # static flat shift of tap (dy, dx)
        acc += jnp.dot(xbuf_ref[pl.ds(s, tm), :], w_ref[t],
                       preferred_element_type=jnp.float32)
    o_ref[...] = acc + b_ref[...]


def shortcut_block(x_nchw, w3, b3, w1, b1, factor=FACTOR):
    """x: (B,Cin,H,W) f32, w3: (Cout,Cin,3,3), w1: (Cout,Cin,1,1) (PyTorch OIHW).

    Returns (B, Cout, H, W) f32 = factor * (conv3x3(x)+b3) + (conv1x1(x)+b1).
    """
    B, Cin, H, W = x_nchw.shape
    Cout = w3.shape[0]

    # ---- fold factor and the 1x1 shortcut into the 3x3 taps (trace-time) ----
    w_taps = jnp.transpose(w3, (2, 3, 1, 0)).reshape(9, Cin, Cout)  # [dy*3+dx, ci, co]
    w_fused = factor * w_taps
    w_fused = w_fused.at[4].add(jnp.transpose(w1[:, :, 0, 0], (1, 0)))  # center tap
    b_fused = factor * b3 + b1

    # ---- stage activation: NHWC + bf16 BEFORE padding (one cheap HBM pass) ----
    x_nhwc = jnp.transpose(x_nchw, (0, 2, 3, 1)).astype(jnp.bfloat16)
    Wp = W + 2
    Hp = H + 3   # 1 top halo + 1 bottom halo + 1 guard row for the flat windows
    x_pad = jnp.pad(x_nhwc, ((0, 0), (1, 2), (1, 1), (0, 0)))       # (B,Hp,Wp,Cin)

    # Flat virtual-output index q = b*Hp*Wp + h*Wp + w ; tap (dy,dx) reads
    # x_flat[q + dy*Wp + dx].  Rows with w >= W or h >= H are garbage and are
    # sliced off after the kernel (valid rows never read across a batch).
    Lx = Hp * Wp
    M_flat = B * Lx
    x_flat = x_pad.reshape(M_flat, Cin)

    s_max = 2 * Wp + 2
    HALO = _round_up(s_max, 16)

    TM = 512                                  # multiple of 256; amortizes ~0.35us/step
    if M_flat < TM:
        TM = max(16, _round_up(M_flat, 16))   # bf16 min tile is (16, 128)
    TM = max(TM, HALO)

    num_tiles = (M_flat + TM - 1) // TM
    Mpad = num_tiles * TM
    Npad = _round_up(Cout, LANE)
    K = 9 * Cin

    # Pad to (num_tiles + 1) full tiles: the extra zero tile is only ever read
    # as the bottom halo of the last tile, whose affected rows are garbage.
    x_big = jnp.pad(x_flat, ((0, (num_tiles + 1) * TM - M_flat), (0, 0)))
    x_tiles = x_big.reshape(num_tiles + 1, TM, Cin)

    w_k = jnp.pad(w_fused, ((0, 0), (0, 0), (0, Npad - Cout))).astype(jnp.bfloat16)
    b_k = jnp.pad(b_fused, (0, Npad - Cout)).reshape(1, Npad).astype(jnp.float32)

    kernel = functools.partial(_fused_conv_kernel, wp=Wp, tm=TM, halo=HALO)

    cost = pl.CostEstimate(
        flops=2 * Mpad * K * Npad,
        transcendentals=0,
        bytes_accessed=(Mpad + num_tiles * HALO) * Cin * 2
        + 9 * Cin * Npad * 2 + Npad * 4 + Mpad * Npad * 4,
    )

    out_slab = pl.pallas_call(
        kernel,
        out_shape=jax.ShapeDtypeStruct((Mpad, Npad), jnp.float32),
        grid_spec=pltpu.PrefetchScalarGridSpec(
            num_scalar_prefetch=0,
            grid=(num_tiles,),
            in_specs=[
                pl.BlockSpec((1, TM, Cin), lambda m: (m, 0, 0)),        # current tile
                pl.BlockSpec((1, HALO, Cin), lambda m: (m + 1, 0, 0)),  # bottom halo
                pl.BlockSpec((9, Cin, Npad), lambda m: (0, 0, 0)),      # resident weights
                pl.BlockSpec((1, Npad), lambda m: (0, 0)),              # resident bias
            ],
            out_specs=pl.BlockSpec((TM, Npad), lambda m: (m, 0)),
            scratch_shapes=[pltpu.VMEM((TM + HALO, Cin), jnp.bfloat16)],
        ),
        compiler_params=pltpu.CompilerParams(
            dimension_semantics=("parallel",),
            vmem_limit_bytes=32 * 1024 * 1024,
        ),
        cost_estimate=cost,
    )(x_tiles, x_tiles, w_k, b_k)

    out = out_slab[:M_flat, :Cout].reshape(B, Hp, Wp, Cout)[:, :H, :W, :]
    return jnp.transpose(out, (0, 3, 1, 2))   # back to NCHW (PyTorch layout)


def _reference(x_nchw, w3, b3, w1, b1, factor=FACTOR):
    dn = jax.lax.conv_dimension_numbers(x_nchw.shape, w3.shape,
                                        ("NCHW", "OIHW", "NCHW"))
    base = jax.lax.conv_general_dilated(
        x_nchw, w3, (1, 1), ((1, 1), (1, 1)), dimension_numbers=dn)
    base = base + b3.reshape(1, -1, 1, 1)
    sc = jax.lax.conv_general_dilated(
        x_nchw, w1, (1, 1), ((0, 0), (0, 0)), dimension_numbers=dn)
    sc = sc + b1.reshape(1, -1, 1, 1)
    return base * factor + sc


if __name__ == "__main__":
    key = jax.random.PRNGKey(0)
    k_x, k_w3, k_b3, k_w1, k_b1 = jax.random.split(key, 5)

    B, Cin, Cout, H, W = 2, 4, 4, 16, 16
    x = jax.random.normal(k_x, (B, Cin, H, W), jnp.float32)
    # deterministic synthetic parameters (PyTorch OIHW conv layout)
    w3 = 0.1 * jax.random.normal(k_w3, (Cout, Cin, 3, 3), jnp.float32)
    b3 = 0.1 * jax.random.normal(k_b3, (Cout,), jnp.float32)
    w1 = 0.1 * jax.random.normal(k_w1, (Cout, Cin, 1, 1), jnp.float32)
    b1 = 0.1 * jax.random.normal(k_b1, (Cout,), jnp.float32)

    out = jax.block_until_ready(jax.jit(shortcut_block)(x, w3, b3, w1, b1))
    ref = jax.block_until_ready(_reference(x, w3, b3, w1, b1))

    assert out.shape == (B, Cout, H, W)
    # bf16 MXU inputs, f32 accumulation over K = 9*Cin: tolerance scales with
    # the contraction length and the reference magnitude.
    tol = 2e-2 * max(1.0, float(jnp.max(jnp.abs(ref)))) * max(1.0, (9 * Cin / 36.0) ** 0.5)
    assert float(jnp.max(jnp.abs(out - ref))) < tol, "mismatch vs reference"

    print("KERNEL_OK")
</pallas_src>

<mosaic_0001>
module attributes {stable_mosaic.version = 11 : i64} {
  func.func @_fused_conv_kernel(%arg0: i32, %arg1: memref<1x512x4xbf16, #tpu.memory_space<vmem>>, %arg2: memref<1x48x4xbf16, #tpu.memory_space<vmem>>, %arg3: memref<9x4x128xbf16, #tpu.memory_space<vmem>>, %arg4: memref<1x128xf32, #tpu.memory_space<vmem>>, %arg5: memref<512x128xf32, #tpu.memory_space<vmem>>, %arg6: memref<560x4xbf16, #tpu.memory_space<vmem>>) attributes {dimension_semantics = [#tpu.dimension_semantics<parallel>], iteration_bounds = array<i64: 2>, scalar_prefetch = 0 : i64, scratch_operands = 1 : i64, tpu.core_type = #tpu.core_type<tc>, window_params = [{transform_indices = @transform_0, window_bounds = array<i64: 1, 512, 4>}, {transform_indices = @transform_1, window_bounds = array<i64: 1, 48, 4>}, {pipeline_mode = #tpu.pipeline_mode<synchronous>, transform_indices = @transform_2, window_bounds = array<i64: 9, 4, 128>}, {pipeline_mode = #tpu.pipeline_mode<synchronous>, transform_indices = @transform_3, window_bounds = array<i64: 1, 128>}, {transform_indices = @transform_4, window_bounds = array<i64: 512, 128>}]} {
    %c0 = arith.constant 0 : index
    %c0_0 = arith.constant 0 : index
    %c0_1 = arith.constant 0 : index
    %0 = vector.load %arg1[%c0, %c0_0, %c0_1] : memref<1x512x4xbf16, #tpu.memory_space<vmem>>, vector<1x512x4xbf16>
    %1 = vector.shape_cast %0 : vector<1x512x4xbf16> to vector<512x4xbf16>
    %c0_2 = arith.constant 0 : index
    %c0_3 = arith.constant 0 : index
    %2 = vector.load %arg6[%c0_2, %c0_3] : memref<560x4xbf16, #tpu.memory_space<vmem>>, vector<512x4xbf16>
    tpu.vector_store %arg6[%c0_2, %c0_3], %1 {strides = array<i32>} : memref<560x4xbf16, #tpu.memory_space<vmem>>, vector<512x4xbf16>,
    %c0_4 = arith.constant 0 : index
    %c0_5 = arith.constant 0 : index
    %c0_6 = arith.constant 0 : index
    %3 = vector.load %arg2[%c0_4, %c0_5, %c0_6] : memref<1x48x4xbf16, #tpu.memory_space<vmem>>, vector<1x48x4xbf16>
    %4 = vector.shape_cast %3 : vector<1x48x4xbf16> to vector<48x4xbf16>
    %c512 = arith.constant 512 : index
    %c0_7 = arith.constant 0 : index
    %5 = vector.load %arg6[%c512, %c0_7] : memref<560x4xbf16, #tpu.memory_space<vmem>>, vector<48x4xbf16>
    tpu.vector_store %arg6[%c512, %c0_7], %4 {strides = array<i32>} : memref<560x4xbf16, #tpu.memory_space<vmem>>, vector<48x4xbf16>,
    %cst = arith.constant 0.000000e+00 : f32
    %6 = vector.broadcast %cst : f32 to vector<512x128xf32>
    %c0_8 = arith.constant 0 : index
    %c0_9 = arith.constant 0 : index
    %7 = vector.load %arg6[%c0_8, %c0_9] : memref<560x4xbf16, #tpu.memory_space<vmem>>, vector<512x4xbf16>
    %c0_10 = arith.constant 0 : index
    %c0_11 = arith.constant 0 : index
    %c0_12 = arith.constant 0 : index
    %8 = vector.load %arg3[%c0_10, %c0_11, %c0_12] : memref<9x4x128xbf16, #tpu.memory_space<vmem>>, vector<1x4x128xbf16>
    %9 = vector.shape_cast %8 : vector<1x4x128xbf16> to vector<4x128xbf16>
    %cst_13 = arith.constant dense<0.000000e+00> : vector<512x128xf32>
    %10 = tpu.matmul %7, %9, %cst_13 {dimension_numbers = #tpu.dot_dimension_numbers<[1], [0], [0], [1], [0, 0, 1, 1], [], []>} : vector<512x4xbf16>, vector<4x128xbf16>, vector<512x128xf32> -> vector<512x128xf32>
    %11 = arith.addf %6, %10 : vector<512x128xf32>
    %c1 = arith.constant 1 : index
    %c0_14 = arith.constant 0 : index
    %12 = vector.load %arg6[%c1, %c0_14] : memref<560x4xbf16, #tpu.memory_space<vmem>>, vector<512x4xbf16>
    %c1_15 = arith.constant 1 : index
    %c0_16 = arith.constant 0 : index
    %c0_17 = arith.constant 0 : index
    %13 = vector.load %arg3[%c1_15, %c0_16, %c0_17] : memref<9x4x128xbf16, #tpu.memory_space<vmem>>, vector<1x4x128xbf16>
    %14 = vector.shape_cast %13 : vector<1x4x128xbf16> to vector<4x128xbf16>
    %cst_18 = arith.constant dense<0.000000e+00> : vector<512x128xf32>
    %15 = tpu.matmul %12, %14, %cst_18 {dimension_numbers = #tpu.dot_dimension_numbers<[1], [0], [0], [1], [0, 0, 1, 1], [], []>} : vector<512x4xbf16>, vector<4x128xbf16>, vector<512x128xf32> -> vector<512x128xf32>
    %16 = arith.addf %11, %15 : vector<512x128xf32>
    %c2 = arith.constant 2 : index
    %c0_19 = arith.constant 0 : index
    %17 = vector.load %arg6[%c2, %c0_19] : memref<560x4xbf16, #tpu.memory_space<vmem>>, vector<512x4xbf16>
    %c2_20 = arith.constant 2 : index
    %c0_21 = arith.constant 0 : index
    %c0_22 = arith.constant 0 : index
    %18 = vector.load %arg3[%c2_20, %c0_21, %c0_22] : memref<9x4x128xbf16, #tpu.memory_space<vmem>>, vector<1x4x128xbf16>
    %19 = vector.shape_cast %18 : vector<1x4x128xbf16> to vector<4x128xbf16>
    %cst_23 = arith.constant dense<0.000000e+00> : vector<512x128xf32>
    %20 = tpu.matmul %17, %19, %cst_23 {dimension_numbers = #tpu.dot_dimension_numbers<[1], [0], [0], [1], [0, 0, 1, 1], [], []>} : vector<512x4xbf16>, vector<4x128xbf16>, vector<512x128xf32> -> vector<512x128xf32>
    %21 = arith.addf %16, %20 : vector<512x128xf32>
    %c18 = arith.constant 18 : index
    %c0_24 = arith.constant 0 : index
    %22 = vector.load %arg6[%c18, %c0_24] : memref<560x4xbf16, #tpu.memory_space<vmem>>, vector<512x4xbf16>
    %c3 = arith.constant 3 : index
    %c0_25 = arith.constant 0 : index
    %c0_26 = arith.constant 0 : index
    %23 = vector.load %arg3[%c3, %c0_25, %c0_26] : memref<9x4x128xbf16, #tpu.memory_space<vmem>>, vector<1x4x128xbf16>
    %24 = vector.shape_cast %23 : vector<1x4x128xbf16> to vector<4x128xbf16>
    %cst_27 = arith.constant dense<0.000000e+00> : vector<512x128xf32>
    %25 = tpu.matmul %22, %24, %cst_27 {dimension_numbers = #tpu.dot_dimension_numbers<[1], [0], [0], [1], [0, 0, 1, 1], [], []>} : vector<512x4xbf16>, vector<4x128xbf16>, vector<512x128xf32> -> vector<512x128xf32>
    %26 = arith.addf %21, %25 : vector<512x128xf32>
    %c19 = arith.constant 19 : index
    %c0_28 = arith.constant 0 : index
    %27 = vector.load %arg6[%c19, %c0_28] : memref<560x4xbf16, #tpu.memory_space<vmem>>, vector<512x4xbf16>
    %c4 = arith.constant 4 : index
    %c0_29 = arith.constant 0 : index
    %c0_30 = arith.constant 0 : index
    %28 = vector.load %arg3[%c4, %c0_29, %c0_30] : memref<9x4x128xbf16, #tpu.memory_space<vmem>>, vector<1x4x128xbf16>
    %29 = vector.shape_cast %28 : vector<1x4x128xbf16> to vector<4x128xbf16>
    %cst_31 = arith.constant dense<0.000000e+00> : vector<512x128xf32>
    %30 = tpu.matmul %27, %29, %cst_31 {dimension_numbers = #tpu.dot_dimension_numbers<[1], [0], [0], [1], [0, 0, 1, 1], [], []>} : vector<512x4xbf16>, vector<4x128xbf16>, vector<512x128xf32> -> vector<512x128xf32>
    %31 = arith.addf %26, %30 : vector<512x128xf32>
    %c20 = arith.constant 20 : index
    %c0_32 = arith.constant 0 : index
    %32 = vector.load %arg6[%c20, %c0_32] : memref<560x4xbf16, #tpu.memory_space<vmem>>, vector<512x4xbf16>
    %c5 = arith.constant 5 : index
    %c0_33 = arith.constant 0 : index
    %c0_34 = arith.constant 0 : index
    %33 = vector.load %arg3[%c5, %c0_33, %c0_34] : memref<9x4x128xbf16, #tpu.memory_space<vmem>>, vector<1x4x128xbf16>
    %34 = vector.shape_cast %33 : vector<1x4x128xbf16> to vector<4x128xbf16>
    %cst_35 = arith.constant dense<0.000000e+00> : vector<512x128xf32>
    %35 = tpu.matmul %32, %34, %cst_35 {dimension_numbers = #tpu.dot_dimension_numbers<[1], [0], [0], [1], [0, 0, 1, 1], [], []>} : vector<512x4xbf16>, vector<4x128xbf16>, vector<512x128xf32> -> vector<512x128xf32>
    %36 = arith.addf %31, %35 : vector<512x128xf32>
    %c36 = arith.constant 36 : index
    %c0_36 = arith.constant 0 : index
    %37 = vector.load %arg6[%c36, %c0_36] : memref<560x4xbf16, #tpu.memory_space<vmem>>, vector<512x4xbf16>
    %c6 = arith.constant 6 : index
    %c0_37 = arith.constant 0 : index
    %c0_38 = arith.constant 0 : index
    %38 = vector.load %arg3[%c6, %c0_37, %c0_38] : memref<9x4x128xbf16, #tpu.memory_space<vmem>>, vector<1x4x128xbf16>
    %39 = vector.shape_cast %38 : vector<1x4x128xbf16> to vector<4x128xbf16>
    %cst_39 = arith.constant dense<0.000000e+00> : vector<512x128xf32>
    %40 = tpu.matmul %37, %39, %cst_39 {dimension_numbers = #tpu.dot_dimension_numbers<[1], [0], [0], [1], [0, 0, 1, 1], [], []>} : vector<512x4xbf16>, vector<4x128xbf16>, vector<512x128xf32> -> vector<512x128xf32>
    %41 = arith.addf %36, %40 : vector<512x128xf32>
    %c37 = arith.constant 37 : index
    %c0_40 = arith.constant 0 : index
    %42 = vector.load %arg6[%c37, %c0_40] : memref<560x4xbf16, #tpu.memory_space<vmem>>, vector<512x4xbf16>
    %c7 = arith.constant 7 : index
    %c0_41 = arith.constant 0 : index
    %c0_42 = arith.constant 0 : index
    %43 = vector.load %arg3[%c7, %c0_41, %c0_42] : memref<9x4x128xbf16, #tpu.memory_space<vmem>>, vector<1x4x128xbf16>
    %44 = vector.shape_cast %43 : vector<1x4x128xbf16> to vector<4x128xbf16>
    %cst_43 = arith.constant dense<0.000000e+00> : vector<512x128xf32>
    %45 = tpu.matmul %42, %44, %cst_43 {dimension_numbers = #tpu.dot_dimension_numbers<[1], [0], [0], [1], [0, 0, 1, 1], [], []>} : vector<512x4xbf16>, vector<4x128xbf16>, vector<512x128xf32> -> vector<512x128xf32>
    %46 = arith.addf %41, %45 : vector<512x128xf32>
    %c38 = arith.constant 38 : index
    %c0_44 = arith.constant 0 : index
    %47 = vector.load %arg6[%c38, %c0_44] : memref<560x4xbf16, #tpu.memory_space<vmem>>, vector<512x4xbf16>
    %c8 = arith.constant 8 : index
    %c0_45 = arith.constant 0 : index
    %c0_46 = arith.constant 0 : index
    %48 = vector.load %arg3[%c8, %c0_45, %c0_46] : memref<9x4x128xbf16, #tpu.memory_space<vmem>>, vector<1x4x128xbf16>
    %49 = vector.shape_cast %48 : vector<1x4x128xbf16> to vector<4x128xbf16>
    %cst_47 = arith.constant dense<0.000000e+00> : vector<512x128xf32>
    %50 = tpu.matmul %47, %49, %cst_47 {dimension_numbers = #tpu.dot_dimension_numbers<[1], [0], [0], [1], [0, 0, 1, 1], [], []>} : vector<512x4xbf16>, vector<4x128xbf16>, vector<512x128xf32> -> vector<512x128xf32>
    %51 = arith.addf %46, %50 : vector<512x128xf32>
    %c0_48 = arith.constant 0 : index
    %c0_49 = arith.constant 0 : index
    %52 = vector.load %arg4[%c0_48, %c0_49] : memref<1x128xf32, #tpu.memory_space<vmem>>, vector<1x128xf32>
    %53 = vector.broadcast %52 : vector<1x128xf32> to vector<512x128xf32>
    %54 = arith.addf %51, %53 : vector<512x128xf32>
    %c0_50 = arith.constant 0 : index
    %c0_51 = arith.constant 0 : index
    %55 = vector.load %arg5[%c0_50, %c0_51] : memref<512x128xf32, #tpu.memory_space<vmem>>, vector<512x128xf32>
    tpu.vector_store %arg5[%c0_50, %c0_51], %54 {strides = array<i32>} : memref<512x128xf32, #tpu.memory_space<vmem>>, vector<512x128xf32>,
    return
  }
  func.func @transform_0(%arg0: i32) -> (i32, i32, i32) {
    %c0_i32 = arith.constant 0 : i32
    %c0_i32_0 = arith.constant 0 : i32
    %c0_i32_1 = arith.constant 0 : i32
    return %arg0, %c0_i32, %c0_i32_0 : i32, i32, i32
  }
  func.func @transform_1(%arg0: i32) -> (i32, i32, i32) {
    %c1_i32 = arith.constant 1 : i32
    %0 = arith.addi %arg0, %c1_i32 : i32
    %c0_i32 = arith.constant 0 : i32
    %c0_i32_0 = arith.constant 0 : i32
    %c0_i32_1 = arith.constant 0 : i32
    return %0, %c0_i32, %c0_i32_0 : i32, i32, i32
  }
  func.func @transform_2(%arg0: i32) -> (i32, i32, i32) {
    %c0_i32 = arith.constant 0 : i32
    %c0_i32_0 = arith.constant 0 : i32
    %c0_i32_1 = arith.constant 0 : i32
    %c0_i32_2 = arith.constant 0 : i32
    return %c0_i32, %c0_i32_0, %c0_i32_1 : i32, i32, i32
  }
  func.func @transform_3(%arg0: i32) -> (i32, i32) {
    %c0_i32 = arith.constant 0 : i32
    %c0_i32_0 = arith.constant 0 : i32
    %c0_i32_1 = arith.constant 0 : i32
    return %c0_i32, %c0_i32_0 : i32, i32
  }
  func.func @transform_4(%arg0: i32) -> (i32, i32) {
    %c0_i32 = arith.constant 0 : i32
    %c0_i32_0 = arith.constant 0 : i32
    return %arg0, %c0_i32 : i32, i32
  }
}

</mosaic_0001>

<bundles_post_ra>
// kernel: shortcut_block.1
= control target key start
LH: loop header
LB: loop body
LE: loop exit
PB: predicated region body
PF: predicated region fallthrough
CT: control target
= control target key end

     0   :  { %s7935_s15 = smov 0   ;;  %s9559_s0 = inlined_call_operand.vmem [shape: bf16[3,512,4], index: 0, kind: input, shape index: {}, may-alias: {0,1}]   ;;  %s9560_s1 = inlined_call_operand.vmem [shape: bf16[3,512,4], index: 1, kind: input, shape index: {}, may-alias: {0,1}]   ;;  %s9561_s2 = inlined_call_operand.vmem [shape: bf16[9,4,128], index: 2, kind: input, shape index: {}]   ;;  %s9562_s3 = inlined_call_operand.vmem [shape: f32[1,128], index: 3, kind: input, shape index: {}]   ;;  %s9563_s4 = inlined_call_operand.vmem [shape: f32[1024,128], index: 4, kind: output, shape index: {}]  }
   0x1 LB: > { %s7941_s16 = sadd.s32 4294967295, %s7908_s15   ;;  %p6066_p0 = scmp.ge.s32.totalorder %s7908_s15, 1  ;;  %s7908_s15 = sphi %s7935_s15, %s14_s15  }
   0x2   : > { %p176_p1 = scmp.lt.s32.totalorder %s7908_s15, 3 }
   0x4   : > { %p177_p2 = pnand %p6066_p0, %p176_p1 }
   0x6   : > { %180 = sbr.rel (%p177_p2) target bundleno = 826 (0x33a), region = 36 }
   0xd   : > { %v6108_v0 = vld [vmem:[%s9561_s2 + $0x2] sm:$0x3]  ;;  %vm936_vm0 = vcmask 1041408   ;;  %v6239_v1 = vld [vmem:[%s9561_s2 + $0x8] sm:$0x3]  ;;  %p208_p3 = scmp.lt.s32.totalorder %s7941_s16, 2 }
   0xe   : > { %7814 = vmatprep.subr.msk.bf16.mxu1 %vm936_vm0, %v6108_v0  ;;  %7818 = vmatprep.subr.msk.bf16.mxu0 %vm936_vm0, %v6239_v1  ;;  %v938_v2 = vsel %vm936_vm0, %v6108_v0, 0  ;;  %v7956_v3 = vsel %vm936_vm0, %v6239_v1, 0  ;;  %v575_v4 = vld [vmem:[%s9561_s2] sm:$0x3]  ;;  %v6272_v5 = vld [vmem:[%s9561_s2 + $0xa] sm:$0x3] }
   0xf   : > { %6707 = vmatpush3.bf16.msra.mxu1 %v938_v2  ;;  %6971 = vmatpush3.bf16.msra.mxu0 %v7956_v3  ;;  %s209_s21 = scalar_select %p208_p3, %s7941_s16, 2  ;;  %vm483_vm1 = vcmask 31744   ;;  %vm579_vm2 = vsmask.f32 7424  ;;  %vm2727_vm3 = vsmask.f32 6400 }
  0x10   : > { %7815 = vmatprep.subr.msk.bf16.mxu1 %vm936_vm0, %v575_v4  ;;  %7820 = vmatprep.subr.msk.bf16.mxu0 %vm936_vm0, %v6272_v5  ;;  %v1294_v19 = vsel %vm936_vm0, %v575_v4, 0  ;;  %v7997_v20 = vsel %vm936_vm0, %v6272_v5, 0  ;;  %v8040_v0 = vld [vmem:[%s9561_s2 + $0xc] sm:$0x3]  ;;  %s213_s6 = sadd.s32 1, %s7941_s16  ;;  %vm3481_vm4 = vcmask 1045504  }
  0x11   : > { %s6407_s26 = sshll.u32 %s209_s21, 8  ;;  %p8110_p4 = scmp.lt.s32.totalorder %s213_s6, 2  ;;  %vm1621_vm5 = vcmask 1046528   ;;  %vm4587_vm6 = vsmask.f32 5376  ;;  %vm5341_vm7 = vcmask 1044480  }
  0x12   : > { %s7971_s29 = scalar_lea.vmem %s9559_s0, %s6407_s26  ;;  %s6071_s24 = sshll.u32 %s7941_s16, 6 }
  0x13   : > { %v7832_v6 = vld [vmem:[%s7971_s29] sm:$0xff]   ;;  %v7833_v7 = vld [vmem:[%s7971_s29 + $0x8] sm:$0xff]   ;;  %v7834_v8 = vld [vmem:[%s7971_s29 + $0x10] sm:$0xff]   ;;  %s9669_s6 = smov (!%p8110_p4, %s213_s6), 2  ;;  %p221_p5 = scmp.lt.s32.totalorder %s6071_s24, 127 }
  0x14   : > { %484 = vst.msk [vmem:[#allocation2] sm:$0xff] %vm483_vm1, %v7832_v6  ;;  %485 = vst.msk [vmem:[#allocation2 + $0x8] sm:$0xff] %vm483_vm1, %v7833_v7  ;;  %v7835_v9 = vld [vmem:[%s7971_s29 + $0x18] sm:$0xff]   ;;  %v7836_v10 = vld [vmem:[%s7971_s29 + $0x20] sm:$0xff]   ;;  %s6408_s8 = sshll.u32 %s9669_s6, 8 }
  0x15   : > { %486 = vst.msk [vmem:[#allocation2 + $0x10] sm:$0xff] %vm483_vm1, %v7834_v8  ;;  %487 = vst.msk [vmem:[#allocation2 + $0x18] sm:$0xff] %vm483_vm1, %v7835_v9  ;;  %v7837_v11 = vld [vmem:[%s7971_s29 + $0x28] sm:$0xff]   ;;  %v7838_v12 = vld [vmem:[%s7971_s29 + $0x30] sm:$0xff]   ;;  %s8167_s11 = scalar_lea.vmem %s9560_s1, %s6408_s8  ;;  %s9671_s24 = smov (!%p221_p5, %s6071_s24), 127 }
  0x16   : > { %488 = vst.msk [vmem:[#allocation2 + $0x20] sm:$0xff] %vm483_vm1, %v7836_v10  ;;  %489 = vst.msk [vmem:[#allocation2 + $0x28] sm:$0xff] %vm483_vm1, %v7837_v11  ;;  %v7839_v13 = vld [vmem:[%s7971_s29 + $0x38] sm:$0xff]   ;;  %v7840_v14 = vld [vmem:[%s7971_s29 + $0x40] sm:$0xff]   ;;  %s6072_s25 = sshll.u32 %s9671_s24, 3 }
  0x17   : > { %490 = vst.msk [vmem:[#allocation2 + $0x30] sm:$0xff] %vm483_vm1, %v7838_v12  ;;  %491 = vst.msk [vmem:[#allocation2 + $0x38] sm:$0xff] %vm483_vm1, %v7839_v13  ;;  %v7841_v15 = vld [vmem:[%s7971_s29 + $0x48] sm:$0xff]   ;;  %v7842_v26 = vld [vmem:[%s7971_s29 + $0x50] sm:$0xff]  }
  0x18   : > { %492 = vst.msk [vmem:[#allocation2 + $0x40] sm:$0xff] %vm483_vm1, %v7840_v14  ;;  %493 = vst.msk [vmem:[#allocation2 + $0x48] sm:$0xff] %vm483_vm1, %v7841_v15  ;;  %v7843_v32 = vld [vmem:[%s7971_s29 + $0x58] sm:$0xff]   ;;  %v7844_v37 = vld [vmem:[%s7971_s29 + $0x60] sm:$0xff]  }
  0x19   : > { %494 = vst.msk [vmem:[#allocation2 + $0x50] sm:$0xff] %vm483_vm1, %v7842_v26  ;;  %495 = vst.msk [vmem:[#allocation2 + $0x58] sm:$0xff] %vm483_vm1, %v7843_v32  ;;  %v7845_v43 = vld [vmem:[%s7971_s29 + $0x68] sm:$0xff]   ;;  %v7846_v48 = vld [vmem:[%s7971_s29 + $0x70] sm:$0xff]  }
  0x1a   : > { %496 = vst.msk [vmem:[#allocation2 + $0x60] sm:$0xff] %vm483_vm1, %v7844_v37  ;;  %497 = vst.msk [vmem:[#allocation2 + $0x68] sm:$0xff] %vm483_vm1, %v7845_v43  ;;  %v7847_v54 = vld [vmem:[%s7971_s29 + $0x78] sm:$0xff]   ;;  %v7848_v6 = vld [vmem:[%s7971_s29 + $0x80] sm:$0xff]  }
  0x1b   : > { %v7991_v16 = vld [vmem:[#allocation2] sm:$0xff]  ;;  %v7993_v17 = vld [vmem:[#allocation2 + $0x8] sm:$0xff]  ;;  %498 = vst.msk [vmem:[#allocation2 + $0x70] sm:$0xff] %vm483_vm1, %v7846_v48  ;;  %499 = vst.msk [vmem:[#allocation2 + $0x78] sm:$0xff] %vm483_vm1, %v7847_v54 }
  0x1c   : > { %v2139_v18 = vld [vmem:[#allocation2 + $0x8] sm:$0xfe]  ;;  %v581_v21 = vshrl.u32 %v7991_v16, 16  ;;  %v583_v22 = vshll.u32 %v7991_v16, 16  ;;  %v588_v23 = vshll.u32 %v7993_v17, 16  ;;  %v592_v24 = vshrl.u32 %v7993_v17, 16 }
  0x1d   : > { %v8004_v25 = vld [vmem:[#allocation2 + $0x10] sm:$0xff]  ;;  %v2729_v27 = vshrl.u32 %v2139_v18, 16  ;;  %v2732_v28 = vshll.u32 %v2139_v18, 16  ;;  %v8010_v31 = vld [vmem:[#allocation2 + $0x18] sm:$0xff]  ;;  %v8017_v42 = vld [vmem:[#allocation2 + $0x20] sm:$0xff]  ;;  %500 = vst.msk [vmem:[#allocation2 + $0x80] sm:$0xff] %vm483_vm1, %v7848_v6 }
  0x1e   : > { %v2737_v29 = vshrl.u32 %v8004_v25, 16  ;;  %v2740_v30 = vshll.u32 %v8004_v25, 16  ;;  %v585_v33 = vrot.slane %v583_v22, 1  ;;  %v590_v34 = vrot.slane %v588_v23, 1  ;;  %v8023_v53 = vld [vmem:[#allocation2 + $0x28] sm:$0xff]  ;;  %v8030_v59 = vld [vmem:[#allocation2 + $0x30] sm:$0xff] }
  0x1f   : > { %v2746_v35 = vshrl.u32 %v8010_v31, 16  ;;  %v2749_v36 = vshll.u32 %v8010_v31, 16  ;;  %v2731_v38 = vrot.slane %v2729_v27, 1  ;;  %v2734_v39 = vrot.slane %v2732_v28, 2  ;;  %v8053_v15 = vld [vmem:[#allocation2 + $0x38] sm:$0xff]  ;;  %v7849_v18 = vld [vmem:[%s7971_s29 + $0x88] sm:$0xff]  }
  0x20   : > { %v2739_v40 = vrot.slane %v2737_v29, 1  ;;  %v2742_v41 = vrot.slane %v2740_v30, 2  ;;  %v586_v44 = vor.u32 %v585_v33, %v581_v21  ;;  %v594_v45 = vor.u32 %v592_v24, %v590_v34  ;;  %v8058_v26 = vld [vmem:[#allocation2 + $0x40] sm:$0xff]  ;;  %501 = vst.msk [vmem:[#allocation2 + $0x88] sm:$0xff] %vm483_vm1, %v7849_v18  ;;  %v7850_v27 = vld [vmem:[%s7971_s29 + $0x90] sm:$0xff]   ;;  %v7851_v32 = vld [vmem:[%s7971_s29 + $0x98] sm:$0xff]  }
  0x21   : > { %v598_v46 = vrot.slane %v2740_v30, 1  ;;  %v2748_v47 = vrot.slane %v2746_v35, 1  ;;  %v2735_v49 = vor.u32 %v2734_v39, %v2731_v38  ;;  %v2751_v51 = vrot.slane %v2749_v36, 2  ;;  %502 = vst.msk [vmem:[#allocation2 + $0x90] sm:$0xff] %vm483_vm1, %v7850_v27  ;;  %v8074_v39 = vld [vmem:[#allocation2 + $0x48] sm:$0xff]  ;;  %503 = vst.msk [vmem:[#allocation2 + $0x98] sm:$0xff] %vm483_vm1, %v7851_v32 }
  0x22   : > { %v2743_v50 = vor.u32 %v2742_v41, %v2739_v40  ;;  %v606_v52 = vrot.slane %v2749_v36, 1  ;;  %v591_v55 = vsel %vm579_vm2, %v586_v44, %v590_v34  ;;  %v2755_v58 = vshrl.u32 %v8017_v42, 16  ;;  %v8080_v44 = vld [vmem:[#allocation2 + $0x50] sm:$0xff]  ;;  %v7856_v18 = vld [vmem:[%s7971_s29 + $0xc0] sm:$0xff]  }
  0x23   : > { %v599_v56 = vsel %vm579_vm2, %v594_v45, %v598_v46  ;;  %v602_v57 = vor.u32 %v2737_v29, %v598_v46  ;;  %6708 = vmatprep.mubr.msk.bf16.mxu1 %vm483_vm1, %v591_v55  ;;  %v2752_v61 = vor.u32 %v2751_v51, %v2748_v47  ;;  %v2758_v62 = vshll.u32 %v8017_v42, 16  ;;  %v7852_v45 = vld [vmem:[%s7971_s29 + $0xa0] sm:$0xff]   ;;  %508 = vst.msk [vmem:[#allocation2 + $0xc0] sm:$0xff] %vm483_vm1, %v7856_v18 }
  0x24   : > { %v2744_v60 = vsel %vm2727_vm3, %v2735_v49, %v2743_v50  ;;  %v610_v63 = vor.u32 %v2746_v35, %v606_v52  ;;  %6709 = vmatmul.mubr.msk.bf16.vlgmr.msra.gmra.mrb[0].mxu1 %vm483_vm1, %v599_v56  ;;  %v2757_v2 = vrot.slane %v2755_v58, 1  ;;  %v2764_v4 = vshrl.u32 %v8023_v53, 16  ;;  %504 = vst.msk [vmem:[#allocation2 + $0xa0] sm:$0xff] %vm483_vm1, %v7852_v45 }
  0x25   : > { %6972 = vmatprep.mubr.msk.bf16.mxu0 %vm483_vm1, %v2744_v60  ;;  %v607_v1 = vsel %vm579_vm2, %v602_v57, %v606_v52  ;;  %v2767_v5 = vshll.u32 %v8023_v53, 16  ;;  %6773 = vmatpush3.bf16.msra.mxu1 %v1294_v19  ;;  %v2753_v7 = vsel %vm2727_vm3, %v2743_v50, %v2752_v61  ;;  %v2760_v8 = vrot.slane %v2758_v62, 2 }
  0x26   : > { %6712 = vmatprep.mubr.msk.bf16.mxu1 %vm483_vm1, %v607_v1  ;;  %v614_v9 = vrot.slane %v2758_v62, 1  ;;  %v2773_v10 = vshrl.u32 %v8030_v59, 16  ;;  %6973 = vmatmul.mubr.msk.bf16.vlgmr.msra.gmra.mrb[0].mxu0 %vm483_vm1, %v2753_v7  ;;  %v2766_v11 = vrot.slane %v2764_v4, 1  ;;  %v2776_v14 = vshll.u32 %v8030_v59, 16  ;;  %v8095_v62 = vld [vmem:[#allocation2 + $0x58] sm:$0xff] }
  0x27   : > { %v2769_v12 = vrot.slane %v2767_v5, 2  ;;  %v622_v13 = vrot.slane %v2767_v5, 1  ;;  %7037 = vmatpush3.bf16.msra.mxu0 %v7997_v20  ;;  %v2761_v19 = vor.u32 %v2760_v8, %v2757_v2  ;;  %v2782_v30 = vshrl.u32 %v8053_v15, 16 }
  0x28   : > { %v618_v21 = vor.u32 %v2755_v58, %v614_v9  ;;  %v2775_v22 = vrot.slane %v2773_v10, 1  ;;  %v2778_v24 = vrot.slane %v2776_v14, 2  ;;  %7821 = vmatprep.subr.msk.bf16.mxu0 %vm936_vm0, %v8040_v0  ;;  %v615_v29 = vsel %vm579_vm2, %v610_v63, %v614_v9  ;;  %v7853_v63 = vld [vmem:[%s7971_s29 + $0xa8] sm:$0xff]  }
  0x29   : > { %v2770_v23 = vor.u32 %v2769_v12, %v2766_v11  ;;  %v2762_v28 = vsel %vm2727_vm3, %v2752_v61, %v2761_v19  ;;  %v2785_v20 = vshll.u32 %v8053_v15, 16  ;;  %v2784_v36 = vrot.slane %v2782_v30, 1  ;;  %505 = vst.msk [vmem:[#allocation2 + $0xa8] sm:$0xff] %vm483_vm1, %v7853_v63 }
  0x2a   : > { %6976 = vmatprep.mubr.msk.bf16.mxu0 %vm483_vm1, %v2762_v28  ;;  %v623_v33 = vsel %vm579_vm2, %v618_v21, %v622_v13  ;;  %v2779_v34 = vor.u32 %v2778_v24, %v2775_v22  ;;  %v2791_v38 = vshrl.u32 %v8058_v26, 16  ;;  %v630_v41 = vrot.slane %v2776_v14, 1  ;;  %v7855_v14 = vld [vmem:[%s7971_s29 + $0xb8] sm:$0xff]   ;;  %v7857_v22 = vld [vmem:[%s7971_s29 + $0xc8] sm:$0xff]  }
  0x2b   : > { %v2771_v35 = vsel %vm2727_vm3, %v2761_v19, %v2770_v23  ;;  %v2787_v37 = vrot.slane %v2785_v20, 2  ;;  %v2794_v43 = vshll.u32 %v8058_v26, 16  ;;  %v626_v46 = vor.u32 %v2764_v4, %v622_v13  ;;  %v7854_v4 = vld [vmem:[%s7971_s29 + $0xb0] sm:$0xff]   ;;  %507 = vst.msk [vmem:[#allocation2 + $0xb8] sm:$0xff] %vm483_vm1, %v7855_v14  ;;  %509 = vst.msk [vmem:[#allocation2 + $0xc8] sm:$0xff] %vm483_vm1, %v7857_v22 }
  0x2c   : > { %6713 = vmatmul.mubr.msk.bf16.gmra.mrb[4].mxu1 %vm483_vm1, %v615_v29  ;;  %v2780_v40 = vsel %vm2727_vm3, %v2770_v23, %v2779_v34  ;;  %v2793_v47 = vrot.slane %v2791_v38, 1  ;;  %v634_v48 = vor.u32 %v2773_v10, %v630_v41  ;;  %v638_v49 = vrot.slane %v2785_v20, 1  ;;  %v8105_v10 = vld [vmem:[#allocation2 + $0x60] sm:$0xff]  ;;  %506 = vst.msk [vmem:[#allocation2 + $0xb0] sm:$0xff] %vm483_vm1, %v7854_v4  ;;  %v7858_v29 = vld [vmem:[%s7971_s29 + $0xd0] sm:$0xff]   ;;  %v7859_v20 = vld [vmem:[%s7971_s29 + $0xd8] sm:$0xff]  }
  0x2d   : > { %6716 = vmatprep.mubr.msk.bf16.mxu1 %vm483_vm1, %v623_v33  ;;  %v2796_v50 = vrot.slane %v2794_v43, 2  ;;  %v2800_v51 = vshrl.u32 %v8074_v39, 16  ;;  %v2788_v52 = vor.u32 %v2787_v37, %v2784_v36  ;;  %v2803_v54 = vshll.u32 %v8074_v39, 16  ;;  %510 = vst.msk [vmem:[#allocation2 + $0xd0] sm:$0xff] %vm483_vm1, %v7858_v29  ;;  %511 = vst.msk [vmem:[#allocation2 + $0xd8] sm:$0xff] %vm483_vm1, %v7859_v20 }
  0x2e   : > { %6977 = vmatmul.mubr.msk.bf16.gmra.mrb[4].mxu0 %vm483_vm1, %v2771_v35  ;;  %v2809_v55 = vshrl.u32 %v8080_v44, 16  ;;  %v2812_v56 = vshll.u32 %v8080_v44, 16  ;;  %v631_v58 = vsel %vm579_vm2, %v626_v46, %v630_v41  ;;  %v639_v60 = vsel %vm579_vm2, %v634_v48, %v638_v49  ;;  %v8146_v41 = vld [vmem:[#allocation2 + $0x70] sm:$0xff]  ;;  %v7861_v46 = vld [vmem:[%s7971_s29 + $0xe8] sm:$0xff]  }
  0x2f   : > { %6980 = vmatprep.mubr.msk.bf16.mxu0 %vm483_vm1, %v2780_v40  ;;  %v2797_v57 = vor.u32 %v2796_v50, %v2793_v47  ;;  %v2802_v61 = vrot.slane %v2800_v51, 1  ;;  %v2789_v1 = vsel %vm2727_vm3, %v2779_v34, %v2788_v52  ;;  %v2805_v2 = vrot.slane %v2803_v54, 2  ;;  %v8144_v40 = vld [vmem:[#allocation2 + $0x68] sm:$0xff]  ;;  %513 = vst.msk [vmem:[#allocation2 + $0xe8] sm:$0xff] %vm483_vm1, %v7861_v46 }
  0x30   : > { %v646_v6 = vrot.slane %v2794_v43, 1  ;;  %v2811_v7 = vrot.slane %v2809_v55, 1  ;;  %v2814_v8 = vrot.slane %v2812_v56, 2  ;;  %v642_v9 = vor.u32 %v2782_v30, %v638_v49  ;;  %v7860_v43 = vld [vmem:[%s7971_s29 + $0xe0] sm:$0xff]  }
  0x31   : > { %v2798_v5 = vsel %vm2727_vm3, %v2788_v52, %v2797_v57  ;;  %v654_v12 = vrot.slane %v2803_v54, 1  ;;  %v2818_v13 = vshrl.u32 %v8095_v62, 16  ;;  %v2806_v19 = vor.u32 %v2805_v2, %v2802_v61  ;;  %512 = vst.msk [vmem:[#allocation2 + $0xe0] sm:$0xff] %vm483_vm1, %v7860_v43  ;;  %v7862_v54 = vld [vmem:[%s7971_s29 + $0xf0] sm:$0xff]   ;;  %v7864_v2 = vld [vmem:[%s8167_s11] sm:$0xff]  }
  0x32   : > { %v650_v11 = vor.u32 %v2791_v38, %v646_v6  ;;  %v2821_v21 = vshll.u32 %v8095_v62, 16  ;;  %v2815_v23 = vor.u32 %v2814_v8, %v2811_v7  ;;  %v2827_v24 = vshrl.u32 %v8105_v10, 16  ;;  %514 = vst.msk [vmem:[#allocation2 + $0xf0] sm:$0xff] %vm483_vm1, %v7862_v54  ;;  %v8178_v8 = vld [vmem:[#allocation2 + $0x78] sm:$0xff]  ;;  %540 = vst.msk [vmem:[#allocation2 + $0x100] sm:$0xff] %vm483_vm1, %v7864_v2 }
  0x33   : > { %v2830_v27 = vshll.u32 %v8105_v10, 16  ;;  %v647_v28 = vsel %vm579_vm2, %v642_v9, %v646_v6  ;;  %v2807_v32 = vsel %vm2727_vm3, %v2797_v57, %v2806_v19  ;;  %v2820_v33 = vrot.slane %v2818_v13, 1  ;;  %v8183_v9 = vld [vmem:[%s9561_s2 + $0x4] sm:$0x3] }
  0x34   : > { %6717 = vmatmul.mubr.msk.bf16.gmra.mrb[8].mxu1 %vm483_vm1, %v631_v58  ;;  %v655_v30 = vsel %vm579_vm2, %v650_v11, %v654_v12  ;;  %v2823_v34 = vrot.slane %v2821_v21, 2  ;;  %v2816_v35 = vsel %vm2727_vm3, %v2806_v19, %v2815_v23  ;;  %v662_v36 = vrot.slane %v2812_v56, 1  ;;  %v7863_v58 = vld [vmem:[%s7971_s29 + $0xf8] sm:$0xff]   ;;  %7816 = vmatprep.subr.msk.bf16.mxu1 %vm936_vm0, %v8183_v9  ;;  %s9402_s29 = scalar_lea.vmem %s9563_s4, %s6072_s25 }
  0x35   : > { %6720 = vmatprep.mubr.msk.bf16.mxu1 %vm483_vm1, %v639_v60  ;;  %v2829_v37 = vrot.slane %v2827_v24, 1  ;;  %v2832_v38 = vrot.slane %v2830_v27, 2  ;;  %v658_v45 = vor.u32 %v2800_v51, %v654_v12  ;;  %v670_v48 = vrot.slane %v2821_v21, 1  ;;  %515 = vst.msk [vmem:[#allocation2 + $0xf8] sm:$0xff] %vm483_vm1, %v7863_v58  ;;  %v8188_v12 = vld [vmem:[#allocation2 + $0x80] sm:$0xff] }
  0x36   : > { %6981 = vmatmul.mubr.msk.bf16.gmra.mrb[8].mxu0 %vm483_vm1, %v2789_v1  ;;  %v666_v47 = vor.u32 %v2809_v55, %v662_v36  ;;  %v2824_v49 = vor.u32 %v2823_v34, %v2820_v33  ;;  %v2836_v50 = vshrl.u32 %v8144_v40, 16  ;;  %v2839_v52 = vshll.u32 %v8144_v40, 16 }
  0x37   : > { %6984 = vmatprep.mubr.msk.bf16.mxu0 %vm483_vm1, %v2798_v5  ;;  %v2833_v51 = vor.u32 %v2832_v38, %v2829_v37  ;;  %v2845_v56 = vshrl.u32 %v8146_v41, 16  ;;  %v2848_v57 = vshll.u32 %v8146_v41, 16  ;;  %v663_v55 = vsel %vm579_vm2, %v658_v45, %v662_v36  ;;  %v8206_v36 = vld [vmem:[#allocation2 + $0x88] sm:$0xff] }
  0x38   : > { %v671_v60 = vsel %vm579_vm2, %v666_v47, %v670_v48  ;;  %v2825_v61 = vsel %vm2727_vm3, %v2815_v23, %v2824_v49  ;;  %v2838_v63 = vrot.slane %v2836_v50, 1  ;;  %v2841_v1 = vrot.slane %v2839_v52, 2 }
  0x39   : > { %v2834_v4 = vsel %vm2727_vm3, %v2824_v49, %v2833_v51  ;;  %v678_v5 = vrot.slane %v2830_v27, 1  ;;  %v2847_v6 = vrot.slane %v2845_v56, 1  ;;  %v2850_v7 = vrot.slane %v2848_v57, 2 }
  0x3a   : > { %v674_v11 = vor.u32 %v2818_v13, %v670_v48  ;;  %v686_v18 = vrot.slane %v2839_v52, 1  ;;  %v2842_v19 = vor.u32 %v2841_v1, %v2838_v63  ;;  %v2854_v21 = vshrl.u32 %v8178_v8, 16  ;;  %v7865_v52 = vld [vmem:[%s8167_s11 + $0x8] sm:$0xff]  }
  0x3b   : > { %v682_v14 = vor.u32 %v2827_v24, %v678_v5  ;;  %v2857_v13 = vshll.u32 %v8178_v8, 16  ;;  %v2851_v22 = vor.u32 %v2850_v7, %v2847_v6  ;;  %v2863_v23 = vshrl.u32 %v8188_v12, 16  ;;  %541 = vst.msk [vmem:[#allocation2 + $0x108] sm:$0xff] %vm483_vm1, %v7865_v52  ;;  %v8265_v52 = vld [vmem:[%s9561_s2 + $0xe] sm:$0x3] }
  0x3c   : > { %6721 = vmatmul.mubr.msk.bf16.gmra.mrb[12].mxu1 %vm483_vm1, %v647_v28  ;;  %v2866_v27 = vshll.u32 %v8188_v12, 16  ;;  %v679_v28 = vsel %vm579_vm2, %v674_v11, %v678_v5  ;;  %v2856_v24 = vrot.slane %v2854_v21, 1  ;;  %v694_v33 = vrot.slane %v2848_v57, 1 }
  0x3d   : > { %6724 = vmatprep.mubr.msk.bf16.mxu1 %vm483_vm1, %v655_v30  ;;  %v687_v29 = vsel %vm579_vm2, %v682_v14, %v686_v18  ;;  %v2843_v30 = vsel %vm2727_vm3, %v2833_v51, %v2842_v19  ;;  %v2859_v20 = vrot.slane %v2857_v13, 2  ;;  %v2865_v34 = vrot.slane %v2863_v23, 1 }
  0x3e   : > { %6985 = vmatmul.mubr.msk.bf16.gmra.mrb[12].mxu0 %vm483_vm1, %v2807_v32  ;;  %v2852_v32 = vsel %vm2727_vm3, %v2842_v19, %v2851_v22  ;;  %v690_v37 = vor.u32 %v2836_v50, %v686_v18  ;;  %v698_v38 = vor.u32 %v2845_v56, %v694_v33  ;;  %v702_v43 = vrot.slane %v2857_v13, 1 }
  0x3f   : > { %6988 = vmatprep.mubr.msk.bf16.mxu0 %vm483_vm1, %v2816_v35  ;;  %v2868_v35 = vrot.slane %v2866_v27, 2  ;;  %v2860_v45 = vor.u32 %v2859_v20, %v2856_v24  ;;  %v2872_v46 = vshrl.u32 %v8206_v36, 16  ;;  %v2875_v47 = vshll.u32 %v8206_v36, 16  ;;  %v8245_v24 = vld [vmem:[#allocation2 + $0xa8] sm:$0xff] }
  0x40   : > { %v695_v49 = vsel %vm579_vm2, %v690_v37, %v694_v33  ;;  %v703_v54 = vsel %vm579_vm2, %v698_v38, %v702_v43  ;;  %v706_v58 = vor.u32 %v2854_v21, %v702_v43  ;;  %v3483_v6 = vrot.slane %v8004_v25, 2 }
  0x41   : > { %v2869_v48 = vor.u32 %v2868_v35, %v2865_v34  ;;  %v2861_v51 = vsel %vm2727_vm3, %v2851_v22, %v2860_v45  ;;  %v2874_v50 = vrot.slane %v2872_v46, 1  ;;  %v2877_v57 = vrot.slane %v2875_v47, 2 }
  0x42   : > { %v718_v1 = vrot.slane %v2875_v47, 1  ;;  %v3487_v20 = vrot.slane %v8017_v42, 2  ;;  %v748_v38 = vshll.u32 %v8245_v24, 16 }
  0x43   : > { %v2870_v56 = vsel %vm2727_vm3, %v2860_v45, %v2869_v48  ;;  %v8225_v2 = vor.u32 %v2877_v57, %v2874_v50  ;;  %v4229_v45 = vsel %vm936_vm0, %v8040_v0, 0  ;;  %v3489_v0 = vrot.slane %v8023_v53, 2  ;;  %v8270_v50 = vld [vmem:[#allocation2 + $0xb8] sm:$0xff] }
  0x44   : > { %6725 = vmatmul.mubr.msk.bf16.gmra.mrb[16].mxu1 %vm483_vm1, %v663_v55  ;;  %v710_v55 = vrot.slane %v2866_v27, 1  ;;  %v8240_v27 = vld [vmem:[#allocation2 + $0xa0] sm:$0xff]  ;;  %v3491_v57 = vrot.slane %v8030_v59, 2 }
  0x45   : > { %6728 = vmatprep.mubr.msk.bf16.mxu1 %vm483_vm1, %v671_v60  ;;  %v3476_v60 = vld [vmem:[#allocation2 + $0x8] sm:$0xfc]  ;;  %9613 = vst [vmem:[#allocation3_spill] sm:$0xff] %v8225_v2  ;;  %v2879_v21 = vsel %vm2727_vm3, %v2869_v48, %v8225_v2  ;;  %v744_v37 = vshrl.u32 %v8240_v27, 16 }
  0x46   : > { %6989 = vmatmul.mubr.msk.bf16.gmra.mrb[16].mxu0 %vm483_vm1, %v2825_v61  ;;  %v8221_v61 = vld [vmem:[#allocation2 + $0x90] sm:$0xff]  ;;  %v714_v63 = vor.u32 %v2863_v23, %v710_v55  ;;  %v3482_v5 = vrot.slane %v3476_v60, 2  ;;  %v711_v11 = vsel %vm579_vm2, %v706_v58, %v710_v55  ;;  %v722_v23 = vor.u32 %v2872_v46, %v718_v1 }
  0x47   : > { %6992 = vmatprep.mubr.msk.bf16.mxu0 %vm483_vm1, %v2834_v4  ;;  %v8227_v4 = vld [vmem:[#allocation2 + $0x98] sm:$0xff]  ;;  %v724_v7 = vshll.u32 %v8221_v61, 16  ;;  %v728_v18 = vshrl.u32 %v8221_v61, 16  ;;  %v752_v58 = vshrl.u32 %v8245_v24, 16 }
  0x48   : > { %v719_v14 = vsel %vm579_vm2, %v714_v63, %v718_v1  ;;  %v732_v19 = vshll.u32 %v8227_v4, 16  ;;  %v3484_v13 = vsel %vm3481_vm4, %v3482_v5, %v3483_v6  ;;  %v736_v34 = vshrl.u32 %v8227_v4, 16 }
  0x49   : > { %v726_v22 = vrot.slane %v724_v7, 1  ;;  %v764_v1 = vshll.u32 %v8270_v50, 16  ;;  %v3490_v5 = vsel %vm3481_vm4, %v3487_v20, %v3489_v0 }
  0x4b   : > { %v727_v33 = vsel %vm579_vm2, %v722_v23, %v726_v22 }
  0x4c   : > { %6729 = vmatmul.mubr.msk.bf16.gmra.mrb[20].mxu1 %vm483_vm1, %v679_v28  ;;  %v730_v28 = vor.u32 %v728_v18, %v726_v22  ;;  %v3495_v22 = vrot.slane %v8058_v26, 2 }
  0x4d   : > { %6732 = vmatprep.mubr.msk.bf16.mxu1 %vm483_vm1, %v687_v29  ;;  %v734_v29 = vrot.slane %v732_v19, 1  ;;  %v766_v19 = vrot.slane %v764_v1, 1 }
  0x4e   : > { %6993 = vmatmul.mubr.msk.bf16.gmra.mrb[20].mxu0 %vm483_vm1, %v2843_v30  ;;  %v3485_v30 = vrot.slane %v8010_v31, 2 }
  0x4f   : > { %6996 = vmatprep.mubr.msk.bf16.mxu0 %vm483_vm1, %v2852_v32  ;;  %v740_v32 = vshll.u32 %v8240_v27, 16  ;;  %v735_v35 = vsel %vm579_vm2, %v730_v28, %v734_v29  ;;  %v738_v48 = vor.u32 %v736_v34, %v734_v29  ;;  %v768_v29 = vshrl.u32 %v8270_v50, 16 }
  0x50   : > { %v3486_v43 = vsel %vm3481_vm4, %v3483_v6, %v3485_v30  ;;  %v3488_v46 = vsel %vm3481_vm4, %v3485_v30, %v3487_v20  ;;  %v3492_v6 = vsel %vm3481_vm4, %v3489_v0, %v3491_v57 }
  0x51   : > { %v742_v47 = vrot.slane %v740_v32, 1 }
  0x53   : > { %v743_v55 = vsel %vm579_vm2, %v738_v48, %v742_v47  ;;  %v8311_v48 = vrot.slane %v8080_v44, 2 }
  0x54   : > { %6733 = vmatmul.mubr.msk.bf16.gmra.mrb[24].mxu1 %vm483_vm1, %v695_v49  ;;  %v8260_v49 = vld [vmem:[#allocation2 + $0xb0] sm:$0xff] }
  0x55   : > { %6736 = vmatprep.mubr.msk.bf16.mxu1 %vm483_vm1, %v703_v54  ;;  %v746_v54 = vor.u32 %v744_v37, %v742_v47  ;;  %v760_v63 = vshrl.u32 %v8260_v49, 16  ;;  %v770_v37 = vor.u32 %v768_v29, %v766_v19  ;;  %v8308_v47 = vld [vmem:[#allocation2 + $0xd8] sm:$0xff] }
  0x56   : > { %6997 = vmatmul.mubr.msk.bf16.gmra.mrb[24].mxu0 %vm483_vm1, %v2861_v51  ;;  %v750_v51 = vrot.slane %v748_v38, 1  ;;  %v8303_v38 = vld [vmem:[#allocation2 + $0xd0] sm:$0xff] }
  0x57   : > { %7000 = vmatprep.mubr.msk.bf16.mxu0 %vm483_vm1, %v2870_v56  ;;  %v756_v56 = vshll.u32 %v8260_v49, 16 }
  0x58   : > { %v751_v60 = vsel %vm579_vm2, %v746_v54, %v750_v51  ;;  %v788_v54 = vshll.u32 %v8303_v38, 16 }
  0x59   : > { %v758_v7 = vrot.slane %v756_v56, 1  ;;  %v792_v56 = vshrl.u32 %v8303_v38, 16 }
  0x5b   : > { %v762_v18 = vor.u32 %v760_v63, %v758_v7  ;;  %v790_v63 = vrot.slane %v788_v54, 1  ;;  %v3507_v54 = vrot.slane %v8146_v41, 2 }
  0x5c   : > { %6737 = vmatmul.mubr.msk.bf16.gmra.mrb[28].mxu1 %vm483_vm1, %v711_v11  ;;  %v754_v11 = vor.u32 %v752_v58, %v750_v51 }
  0x5d   : > { %6740 = vmatprep.mubr.msk.bf16.mxu1 %vm483_vm1, %v719_v14  ;;  %v8285_v14 = vld [vmem:[#allocation2 + $0xc0] sm:$0xff]  ;;  %v767_v30 = vsel %vm579_vm2, %v762_v18, %v766_v19  ;;  %v8332_v18 = vld [vmem:[#allocation2 + $0xe8] sm:$0xff]  ;;  %v3503_v19 = vrot.slane %v8105_v10, 2 }
  0x5e   : > { %7001 = vmatmul.mubr.msk.bf16.gmra.mrb[28].mxu0 %vm483_vm1, %v2879_v21  ;;  %v3493_v21 = vrot.slane %v8053_v15, 2  ;;  %v772_v23 = vshll.u32 %v8285_v14, 16  ;;  %v759_v28 = vsel %vm579_vm2, %v754_v11, %v758_v7  ;;  %v776_v20 = vshrl.u32 %v8285_v14, 16 }
  0x5f   : > { %7038 = vmatprep.mubr.msk.bf16.mxu0 %vm483_vm1, %v3484_v13  ;;  %v8290_v13 = vld [vmem:[#allocation2 + $0xc8] sm:$0xff]  ;;  %v3501_v11 = vrot.slane %v8095_v62, 2 }
  0x60   : > { %v780_v32 = vshll.u32 %v8290_v13, 16  ;;  %v3496_v34 = vsel %vm3481_vm4, %v3493_v21, %v3495_v22  ;;  %v784_v0 = vshrl.u32 %v8290_v13, 16 }
  0x64   : > { %6741 = vmatmul.mubr.msk.bf16.gmra.mrb[32].mxu1 %vm483_vm1, %v727_v33  ;;  %v3494_v33 = vsel %vm3481_vm4, %v3491_v57, %v3493_v21 }
  0x65   : > { %6744 = vmatprep.mubr.msk.bf16.mxu1 %vm483_vm1, %v735_v35  ;;  %v774_v35 = vrot.slane %v772_v23, 1  ;;  %v8340_v23 = vshrl.u32 %v8308_v47, 16 }
  0x66   : > { %7039 = vmatmul.mubr.msk.bf16.vlgmr.msra.gmra.mrb[0].mxu0 %vm483_vm1, %v3486_v43 }
  0x67   : > { %7103 = vmatpush3.bf16.msra.mxu0 %v4229_v45  ;;  %7042 = vmatprep.mubr.msk.bf16.mxu0 %vm483_vm1, %v3488_v46  ;;  %v778_v43 = vor.u32 %v776_v20, %v774_v35  ;;  %v782_v45 = vrot.slane %v780_v32, 1  ;;  %v3497_v46 = vrot.slane %v8074_v39, 2  ;;  %v775_v51 = vsel %vm579_vm2, %v770_v37, %v774_v35  ;;  %9616 = vst [vmem:[#allocation6_spill] sm:$0xff] %v8340_v23  ;;  %v8360_v35 = vld [vmem:[#allocation2 + $0xf0] sm:$0xff] }
  0x68   : > { %7822 = vmatprep.subr.msk.bf16.mxu0 %vm936_vm0, %v8265_v52  ;;  %v8351_v20 = vsel %vm3481_vm4, %v8311_v48, %v3501_v11  ;;  %v8355_v32 = vsel %vm3481_vm4, %v3501_v11, %v3503_v19 }
  0x69   : > { %v783_v57 = vsel %vm579_vm2, %v778_v43, %v782_v45  ;;  %v3498_v58 = vsel %vm3481_vm4, %v3495_v22, %v3497_v46  ;;  %v786_v1 = vor.u32 %v784_v0, %v782_v45  ;;  %v3505_v45 = vrot.slane %v8144_v40, 2 }
  0x6b   : > { %v791_v22 = vsel %vm579_vm2, %v786_v1, %v790_v63  ;;  %v8391_v1 = vsel %vm3481_vm4, %v3505_v45, %v3507_v54 }
  0x6c   : > { %6745 = vmatmul.mubr.msk.bf16.gmra.mrb[36].mxu1 %vm483_vm1, %v743_v55  ;;  %v8319_v55 = vshll.u32 %v8308_v47, 16 }
  0x6d   : > { %6748 = vmatprep.mubr.msk.bf16.mxu1 %vm483_vm1, %v751_v60  ;;  %v3500_v60 = vsel %vm3481_vm4, %v3497_v46, %v8311_v48  ;;  %v8369_v46 = vld [vmem:[#allocation2 + $0xf8] sm:$0xff] }
  0x6e   : > { %7043 = vmatmul.mubr.msk.bf16.gmra.mrb[4].mxu0 %vm483_vm1, %v3490_v5  ;;  %9614 = vst [vmem:[#allocation4_spill] sm:$0xff] %v8319_v55  ;;  %v8326_v5 = vld [vmem:[#allocation2 + $0xe0] sm:$0xff]  ;;  %v798_v7 = vrot.slane %v8319_v55, 1 }
  0x6f   : > { %7046 = vmatprep.mubr.msk.bf16.mxu0 %vm483_vm1, %v3492_v6  ;;  %v794_v6 = vor.u32 %v792_v56, %v790_v63  ;;  %v8336_v21 = vshll.u32 %v8326_v5, 16  ;;  %v8344_v29 = vshrl.u32 %v8326_v5, 16  ;;  %v8387_v63 = vsel %vm3481_vm4, %v3503_v19, %v3505_v45  ;;  %v8400_v19 = vld [vmem:[#allocation2 + $0x100] sm:$0x1] }
  0x71   : > { %9615 = vst [vmem:[#allocation5_spill] sm:$0xff] %v8336_v21  ;;  %9617 = vst [vmem:[#allocation7_spill] sm:$0xff] %v8344_v29 }
  0x74   : > { %6749 = vmatmul.mubr.msk.bf16.gmra.mrb[40].mxu1 %vm483_vm1, %v759_v28  ;;  %v799_v28 = vsel %vm579_vm2, %v794_v6, %v798_v7 }
  0x75   : > { %6752 = vmatprep.mubr.msk.bf16.mxu1 %vm483_vm1, %v767_v30  ;;  %v8347_v30 = vshll.u32 %v8332_v18, 16 }
  0x76   : > { %7047 = vmatmul.mubr.msk.bf16.gmra.mrb[8].mxu0 %vm483_vm1, %v3494_v33  ;;  %v806_v33 = vrot.slane %v8336_v21, 1 }
  0x77   : > { %7050 = vmatprep.mubr.msk.bf16.mxu0 %vm483_vm1, %v3496_v34  ;;  %9618 = vst [vmem:[#allocation8_spill] sm:$0xff] %v8347_v30  ;;  %v802_v34 = vor.u32 %v8340_v23, %v798_v7  ;;  %v814_v43 = vrot.slane %v8347_v30, 1  ;;  %v8584_v30 = vld [vmem:[#allocation2 + $0x28] sm:$0xff]  ;;  %v8617_v23 = vld [vmem:[#allocation2 + $0x40] sm:$0xff] }
  0x78   : > { %v810_v37 = vor.u32 %v8344_v29, %v806_v33  ;;  %v8596_v29 = vld [vmem:[#allocation2 + $0x30] sm:$0xff] }
  0x79   : > { %v807_v0 = vsel %vm579_vm2, %v802_v34, %v806_v33  ;;  %v3511_v33 = vrot.slane %v8188_v12, 2 }
  0x7a   : > { %v815_v56 = vsel %vm579_vm2, %v810_v37, %v814_v43  ;;  %v8408_v37 = vshrl.u32 %v8369_v46, 16 }
  0x7c   : > { %6753 = vmatmul.mubr.msk.bf16.gmra.mrb[44].mxu1 %vm483_vm1, %v775_v51  ;;  %v8373_v51 = vshll.u32 %v8360_v35, 16  ;;  %9623 = vst [vmem:[#allocation13_spill] sm:$0xff] %v8408_v37 }
  0x7d   : > { %6756 = vmatprep.mubr.msk.bf16.mxu1 %vm483_vm1, %v783_v57  ;;  %v8377_v57 = vshrl.u32 %v8332_v18, 16 }
  0x7e   : > { %7051 = vmatmul.mubr.msk.bf16.gmra.mrb[12].mxu0 %vm483_vm1, %v3498_v58  ;;  %9619 = vst [vmem:[#allocation9_spill] sm:$0xff] %v8373_v51  ;;  %v8381_v58 = vshrl.u32 %v8360_v35, 16  ;;  %v822_v6 = vrot.slane %v8373_v51, 1 }
  0x7f   : > { %7054 = vmatprep.mubr.msk.bf16.mxu0 %vm483_vm1, %v3500_v60  ;;  %9620 = vst [vmem:[#allocation10_spill] sm:$0xff] %v8377_v57  ;;  %v8384_v60 = vshll.u32 %v8369_v46, 16  ;;  %v818_v7 = vor.u32 %v8377_v57, %v814_v43  ;;  %v836_v43 = vshll.u32 %v8400_v19, 16 }
  0x80   : > { %9621 = vst [vmem:[#allocation11_spill] sm:$0xff] %v8381_v58  ;;  %v826_v11 = vor.u32 %v8381_v58, %v822_v6  ;;  %v8580_v58 = vld [vmem:[#allocation2 + $0x20] sm:$0xff] }
  0x81   : > { %9622 = vst [vmem:[#allocation12_spill] sm:$0xff] %v8384_v60  ;;  %v823_v34 = vsel %vm579_vm2, %v818_v7, %v822_v6  ;;  %v838_v6 = vrot.slane %v836_v43, 1  ;;  %v3513_v7 = vrot.slane %v8206_v36, 2 }
  0x84   : > { %6757 = vmatmul.mubr.msk.bf16.gmra.mrb[48].mxu1 %vm483_vm1, %v791_v22  ;;  %v830_v22 = vrot.slane %v8384_v60, 1  ;;  %v8565_v60 = vld [vmem:[#allocation2 + $0x10] sm:$0xfc] }
  0x85   : > { %6760 = vmatprep.mubr.msk.bf16.mxu1 %vm483_vm1, %v799_v28  ;;  %v3509_v28 = vrot.slane %v8178_v8, 2 }
  0x86   : > { %7055 = vmatmul.mubr.msk.bf16.gmra.mrb[16].mxu0 %vm483_vm1, %v8351_v20  ;;  %v831_v45 = vsel %vm579_vm2, %v826_v11, %v830_v22  ;;  %v834_v2 = vor.u32 %v8408_v37, %v830_v22 }
  0x87   : > { %7058 = vmatprep.mubr.msk.bf16.mxu0 %vm483_vm1, %v8355_v32 }
  0x88   : > { %v839_v11 = vsel %vm579_vm2, %v834_v2, %v838_v6  ;;  %v3519_v2 = vrot.slane %v8240_v27, 2 }
  0x8c   : > { %6761 = vmatmul.mubr.msk.bf16.gmra.mrb[52].mxu1 %vm483_vm1, %v807_v0  ;;  %v8413_v0 = vsel %vm3481_vm4, %v3507_v54, %v3509_v28  ;;  %v3515_v54 = vrot.slane %v8221_v61, 2 }
  0x8d   : > { %6764 = vmatprep.mubr.msk.bf16.mxu1 %vm483_vm1, %v815_v56  ;;  %v8417_v56 = vsel %vm3481_vm4, %v3509_v28, %v3511_v33  ;;  %v8429_v28 = vsel %vm3481_vm4, %v3511_v33, %v3513_v7  ;;  %v1784_v33 = vsel %vm936_vm0, %v8183_v9, 0  ;;  %v3521_v9 = vrot.slane %v8245_v24, 2 }
  0x8e   : > { %7059 = vmatmul.mubr.msk.bf16.gmra.mrb[20].mxu0 %vm483_vm1, %v8387_v63  ;;  %v8433_v22 = vsel %vm3481_vm4, %v3513_v7, %v3515_v54  ;;  %v3525_v7 = vrot.slane %v8270_v50, 2 }
  0x8f   : > { %7062 = vmatprep.mubr.msk.bf16.mxu0 %vm483_vm1, %v8391_v1  ;;  %v8469_v6 = vsel %vm3481_vm4, %v3519_v2, %v3521_v9 }
  0x94   : > { %6765 = vmatmul.mubr.msk.bf16.gmra.mrb[56].mxu1 %vm483_vm1, %v823_v34  ;;  %v3517_v34 = vrot.slane %v8227_v4, 2 }
  0x95   : > { %6768 = vmatprep.mubr.msk.bf16.mxu1 %vm483_vm1, %v831_v45 }
  0x96   : > { %7063 = vmatmul.mubr.msk.bf16.gmra.mrb[24].mxu0 %vm483_vm1, %v8413_v0  ;;  %v8446_v43 = vsel %vm3481_vm4, %v3515_v54, %v3517_v34  ;;  %v8456_v45 = vsel %vm3481_vm4, %v3517_v34, %v3519_v2  ;;  %v3527_v54 = vrot.slane %v8285_v14, 2  ;;  %v3531_v34 = vrot.slane %v8303_v38, 2 }
  0x97   : > { %7066 = vmatprep.mubr.msk.bf16.mxu0 %vm483_vm1, %v8417_v56 }
  0x9c   : > { %6769 = vmatmul.mubr.msk.bf16.gmra.mrb[60].mxu1 %vm483_vm1, %v839_v11 }
  0x9d   : > { %6774 = vmatprep.mubr.msk.bf16.mxu1 %vm483_vm1, %v7991_v16  ;;  %v8451_v16 = vld [vmem:[%s9561_s2 + $0x6] sm:$0x3] }
  0x9e   : > { %7067 = vmatmul.mubr.msk.bf16.gmra.mrb[28].mxu0 %vm483_vm1, %v8429_v28 }
  0x9f   : > { %7070 = vmatprep.mubr.msk.bf16.mxu0 %vm483_vm1, %v8433_v22 }
  0xa4   : > { %6775 = vmatmul.mubr.msk.bf16.vlgmr.msra.gmra.mrb[0].mxu1 %vm483_vm1, %v7993_v17  ;;  %v3523_v17 = vrot.slane %v8260_v49, 2 }
  0xa5   : > { %6839 = vmatpush3.bf16.msra.mxu1 %v1784_v33  ;;  %6778 = vmatprep.mubr.msk.bf16.mxu1 %vm483_vm1, %v8004_v25  ;;  %v3535_v33 = vrot.slane %v8326_v5, 2 }
  0xa6   : > { %7071 = vmatmul.mubr.msk.bf16.gmra.mrb[32].mxu0 %vm483_vm1, %v8446_v43  ;;  %7817 = vmatprep.subr.msk.bf16.mxu1 %vm936_vm0, %v8451_v16  ;;  %v8474_v25 = vsel %vm3481_vm4, %v3521_v9, %v3523_v17  ;;  %v8485_v11 = vsel %vm3481_vm4, %v3523_v17, %v3525_v7  ;;  %v3539_v17 = vrot.slane %v8360_v35, 2 }
  0xa7   : > { %7074 = vmatprep.mubr.msk.bf16.mxu0 %vm483_vm1, %v8456_v45 }
  0xac   : > { %6779 = vmatmul.mubr.msk.bf16.gmra.mrb[4].mxu1 %vm483_vm1, %v8010_v31  ;;  %v8490_v31 = vsel %vm3481_vm4, %v3525_v7, %v3527_v54 }
  0xad   : > { %6782 = vmatprep.mubr.msk.bf16.mxu1 %vm483_vm1, %v8017_v42  ;;  %v3529_v42 = vrot.slane %v8290_v13, 2 }
  0xae   : > { %7075 = vmatmul.mubr.msk.bf16.gmra.mrb[36].mxu0 %vm483_vm1, %v8469_v6 }
  0xaf   : > { %7078 = vmatprep.mubr.msk.bf16.mxu0 %vm483_vm1, %v8474_v25  ;;  %v8501_v2 = vsel %vm3481_vm4, %v3527_v54, %v3529_v42  ;;  %v3541_v54 = vrot.slane %v8369_v46, 2 }
  0xb4   : > { %6783 = vmatmul.mubr.msk.bf16.gmra.mrb[8].mxu1 %vm483_vm1, %v8023_v53  ;;  %v8506_v53 = vsel %vm3481_vm4, %v3529_v42, %v3531_v34 }
  0xb5   : > { %6786 = vmatprep.mubr.msk.bf16.mxu1 %vm483_vm1, %v8030_v59  ;;  %v3533_v59 = vrot.slane %v8308_v47, 2 }
  0xb6   : > { %7079 = vmatmul.mubr.msk.bf16.gmra.mrb[40].mxu0 %vm483_vm1, %v8485_v11 }
  0xb7   : > { %7082 = vmatprep.mubr.msk.bf16.mxu0 %vm483_vm1, %v8490_v31  ;;  %v8517_v9 = vsel %vm3481_vm4, %v3531_v34, %v3533_v59  ;;  %v7866_v34 = vld [vmem:[%s8167_s11 + $0x10] sm:$0xff]  }
  0xb8   : > { %542 = vst.msk [vmem:[#allocation2 + $0x110] sm:$0xff] %vm483_vm1, %v7866_v34  ;;  %v4067_v34 = vrot.slane %v8565_v60, 2 }
  0xbc   : > { %6787 = vmatmul.mubr.msk.bf16.gmra.mrb[12].mxu1 %vm483_vm1, %v8053_v15  ;;  %v8522_v15 = vsel %vm3481_vm4, %v3533_v59, %v3535_v33  ;;  %v8554_v59 = vsel %vm3481_vm4, %v3539_v17, %v3541_v54 }
  0xbd   : > { %6790 = vmatprep.mubr.msk.bf16.mxu1 %vm483_vm1, %v8058_v26  ;;  %v3537_v26 = vrot.slane %v8332_v18, 2 }
  0xbe   : > { %7083 = vmatmul.mubr.msk.bf16.gmra.mrb[44].mxu0 %vm483_vm1, %v8501_v2 }
  0xbf   : > { %7086 = vmatprep.mubr.msk.bf16.mxu0 %vm483_vm1, %v8506_v53  ;;  %v8533_v7 = vsel %vm3481_vm4, %v3535_v33, %v3537_v26 }
  0xc4   : > { %6791 = vmatmul.mubr.msk.bf16.gmra.mrb[16].mxu1 %vm483_vm1, %v8074_v39  ;;  %v8538_v39 = vsel %vm3481_vm4, %v3537_v26, %v3539_v17  ;;  %v2724_v26 = vld [vmem:[#allocation2 + $0x108] sm:$0x3] }
  0xc5   : > { %6794 = vmatprep.mubr.msk.bf16.mxu1 %vm483_vm1, %v8080_v44  ;;  %v8542_v44 = vld [vmem:[#allocation2 + $0x100] sm:$0xff]  ;;  %v3545_v17 = vrot.slane %v2724_v26, 2  ;;  %v4070_v26 = vrot.slane %v8580_v58, 2 }
  0xc6   : > { %7087 = vmatmul.mubr.msk.bf16.gmra.mrb[48].mxu0 %vm483_vm1, %v8517_v9  ;;  %9624 = vst [vmem:[#allocation14_spill] sm:$0xff] %v8542_v44  ;;  %v8550_v42 = vrot.slane %v8542_v44, 2  ;;  %v8567_v44 = vld [vmem:[#allocation2 + $0x18] sm:$0xff] }
  0xc7   : > { %7090 = vmatprep.mubr.msk.bf16.mxu0 %vm483_vm1, %v8522_v15 }
  0xc8   : > { %v8561_v33 = vsel %vm3481_vm4, %v3541_v54, %v8550_v42  ;;  %v4068_v54 = vrot.slane %v8567_v44, 2  ;;  %v3546_v37 = vsel %vm3481_vm4, %v8550_v42, %v3545_v17  ;;  %v4072_v17 = vrot.slane %v8584_v30, 2 }
  0xca   : > { %v4069_v51 = vsel %vm3481_vm4, %v4067_v34, %v4068_v54  ;;  %v4071_v57 = vsel %vm3481_vm4, %v4068_v54, %v4070_v26  ;;  %v4981_v34 = vsel %vm936_vm0, %v8265_v52, 0  ;;  %v4073_v21 = vsel %vm3481_vm4, %v4070_v26, %v4072_v17 }
  0xcb   : > { %v4074_v52 = vrot.slane %v8596_v29, 2 }
  0xcc   : > { %6795 = vmatmul.mubr.msk.bf16.gmra.mrb[20].mxu1 %vm483_vm1, %v8095_v62 }
  0xcd   : > { %6798 = vmatprep.mubr.msk.bf16.mxu1 %vm483_vm1, %v8105_v10  ;;  %v4075_v26 = vsel %vm3481_vm4, %v4072_v17, %v4074_v52 }
  0xce   : > { %7091 = vmatmul.mubr.msk.bf16.gmra.mrb[52].mxu0 %vm483_vm1, %v8533_v7 }
  0xcf   : > { %7094 = vmatprep.mubr.msk.bf16.mxu0 %vm483_vm1, %v8538_v39 }
  0xd4   : > { %6799 = vmatmul.mubr.msk.bf16.gmra.mrb[24].mxu1 %vm483_vm1, %v8144_v40 }
  0xd5   : > { %6802 = vmatprep.mubr.msk.bf16.mxu1 %vm483_vm1, %v8146_v41 }
  0xd6   : > { %7095 = vmatmul.mubr.msk.bf16.gmra.mrb[56].mxu0 %vm483_vm1, %v8554_v59 }
  0xd7   : > { %7098 = vmatprep.mubr.msk.bf16.mxu0 %vm483_vm1, %v8561_v33 }
  0xdc   : > { %6803 = vmatmul.mubr.msk.bf16.gmra.mrb[28].mxu1 %vm483_vm1, %v8178_v8 }
  0xdd   : > { %6806 = vmatprep.mubr.msk.bf16.mxu1 %vm483_vm1, %v8188_v12 }
  0xde   : > { %7099 = vmatmul.mubr.msk.bf16.gmra.mrb[60].mxu0 %vm483_vm1, %v3546_v37  ;;  %v8605_v37 = vld [vmem:[%s9561_s2 + $0x10] sm:$0x3] }
  0xdf   : > { %7104 = vmatprep.mubr.msk.bf16.mxu0 %vm483_vm1, %v4069_v51  ;;  %v8600_v51 = vld [vmem:[#allocation2 + $0x38] sm:$0xff] }
  0xe0   : > { %v4076_v54 = vrot.slane %v8600_v51, 2 }
  0xe2   : > { %v4077_v55 = vsel %vm3481_vm4, %v4074_v52, %v4076_v54 }
  0xe4   : > { %6807 = vmatmul.mubr.msk.bf16.gmra.mrb[32].mxu1 %vm483_vm1, %v8206_v36 }
  0xe5   : > { %6810 = vmatprep.mubr.msk.bf16.mxu1 %vm483_vm1, %v8221_v61 }
  0xe6   : > { %7105 = vmatmul.mubr.msk.bf16.vlgmr.msra.gmra.mrb[0].mxu0 %vm483_vm1, %v4071_v57  ;;  %v4078_v57 = vrot.slane %v8617_v23, 2 }
  0xe7   : > { %7169 = vmatpush3.bf16.msra.mxu0 %v4981_v34  ;;  %7108 = vmatprep.mubr.msk.bf16.mxu0 %vm483_vm1, %v4073_v21  ;;  %v8621_v21 = vld [vmem:[#allocation2 + $0x48] sm:$0xff] }
  0xe8   : > { %7823 = vmatprep.subr.msk.bf16.mxu0 %vm936_vm0, %v8605_v37  ;;  %v4080_v17 = vrot.slane %v8621_v21, 2  ;;  %v4079_v34 = vsel %vm3481_vm4, %v4076_v54, %v4078_v57 }
  0xea   : > { %v4081_v52 = vsel %vm3481_vm4, %v4078_v57, %v4080_v17  ;;  %v2369_v57 = vsel %vm936_vm0, %v8451_v16, 0  ;;  %v7872_v16 = vld [vmem:[%s9561_s2 + $0x8] sm:$0x3] }
  0xec   : > { %6811 = vmatmul.mubr.msk.bf16.gmra.mrb[36].mxu1 %vm483_vm1, %v8227_v4 }
  0xed   : > { %6814 = vmatprep.mubr.msk.bf16.mxu1 %vm483_vm1, %v8240_v27 }
  0xee   : > { %7109 = vmatmul.mubr.msk.bf16.gmra.mrb[4].mxu0 %vm483_vm1, %v4075_v26 }
  0xef   : > { %7112 = vmatprep.mubr.msk.bf16.mxu0 %vm483_vm1, %v4077_v55  ;;  %v4083_v55 = vsel %vm3481_vm4, %v4080_v17, %v8311_v48  ;;  %v1585_v48 = vld [vmem:[#allocation2] sm:$0xfe] }
  0xf4   : > { %6815 = vmatmul.mubr.msk.bf16.gmra.mrb[40].mxu1 %vm483_vm1, %v8245_v24 }
  0xf5   : > { %6818 = vmatprep.mubr.msk.bf16.mxu1 %vm483_vm1, %v8260_v49 }
  0xf6   : > { %7113 = vmatmul.mubr.msk.bf16.gmra.mrb[8].mxu0 %vm483_vm1, %v4079_v34 }
  0xf7   : > { %7116 = vmatprep.mubr.msk.bf16.mxu0 %vm483_vm1, %v4081_v52 }
  0xfc   : > { %6819 = vmatmul.mubr.msk.bf16.gmra.mrb[44].mxu1 %vm483_vm1, %v8270_v50 }
  0xfd   : > { %6822 = vmatprep.mubr.msk.bf16.mxu1 %vm483_vm1, %v8285_v14 }
  0xfe   : > { %7117 = vmatmul.mubr.msk.bf16.gmra.mrb[12].mxu0 %vm483_vm1, %v4083_v55 }
  0xff   : > { %7120 = vmatprep.mubr.msk.bf16.mxu0 %vm483_vm1, %v8351_v20  ;;  %v1622_v20 = vrot.slane %v1585_v48, 1 }
 0x104   : > { %6823 = vmatmul.mubr.msk.bf16.gmra.mrb[48].mxu1 %vm483_vm1, %v8290_v13 }
 0x105   : > { %6826 = vmatprep.mubr.msk.bf16.mxu1 %vm483_vm1, %v8303_v38 }
 0x106   : > { %7121 = vmatmul.mubr.msk.bf16.gmra.mrb[16].mxu0 %vm483_vm1, %v8355_v32  ;;  %v7867_v32 = vld [vmem:[#allocation2 + $0x8] sm:$0xff] }
 0x107   : > { %7124 = vmatprep.mubr.msk.bf16.mxu0 %vm483_vm1, %v8387_v63  ;;  %v1623_v63 = vrot.slane %v7867_v32, 1  ;;  %v7874_v32 = vld [vmem:[#allocation2 + $0x38] sm:$0xff] }
 0x10c   : > { %6827 = vmatmul.mubr.msk.bf16.gmra.mrb[52].mxu1 %vm483_vm1, %v8308_v47 }
 0x10d   : > { %6830 = vmatprep.mubr.msk.bf16.mxu1 %vm483_vm1, %v8326_v5 }
 0x10e   : > { %7125 = vmatmul.mubr.msk.bf16.gmra.mrb[20].mxu0 %vm483_vm1, %v8391_v1  ;;  %v1624_v1 = vsel %vm1621_vm5, %v1622_v20, %v1623_v63 }
 0x10f   : > { %7128 = vmatprep.mubr.msk.bf16.mxu0 %vm483_vm1, %v8413_v0  ;;  %v7868_v0 = vld [vmem:[#allocation2 + $0x10] sm:$0xff] }
 0x110   : > { %v8672_v54 = vrot.slane %v7868_v0, 1  ;;  %v7875_v0 = vld [vmem:[#allocation2 + $0x40] sm:$0xff] }
 0x114   : > { %6831 = vmatmul.mubr.msk.bf16.gmra.mrb[56].mxu1 %vm483_vm1, %v8332_v18 }
 0x115   : > { %6834 = vmatprep.mubr.msk.bf16.mxu1 %vm483_vm1, %v8360_v35 }
 0x116   : > { %7129 = vmatmul.mubr.msk.bf16.gmra.mrb[24].mxu0 %vm483_vm1, %v8417_v56  ;;  %v7869_v56 = vld [vmem:[#allocation2 + $0x18] sm:$0xff] }
 0x117   : > { %7132 = vmatprep.mubr.msk.bf16.mxu0 %vm483_vm1, %v8429_v28  ;;  %v1627_v26 = vrot.slane %v7869_v56, 1  ;;  %v1626_v28 = vsel %vm1621_vm5, %v1623_v63, %v8672_v54  ;;  %v1635_v63 = vrot.slane %v7874_v32, 1  ;;  %v1637_v56 = vrot.slane %v7875_v0, 1 }
 0x119   : > { %v8684_v17 = vsel %vm1621_vm5, %v8672_v54, %v1627_v26 }
 0x11c   : > { %6835 = vmatmul.mubr.msk.bf16.gmra.mrb[60].mxu1 %vm483_vm1, %v8369_v46 }
 0x11d   : > { %6840 = vmatprep.mubr.msk.bf16.mxu1 %vm483_vm1, %v1624_v1 }
 0x11e   : > { %7133 = vmatmul.mubr.msk.bf16.gmra.mrb[28].mxu0 %vm483_vm1, %v8433_v22  ;;  %v7870_v22 = vld [vmem:[#allocation2 + $0x20] sm:$0xff] }
 0x11f   : > { %7136 = vmatprep.mubr.msk.bf16.mxu0 %vm483_vm1, %v8446_v43  ;;  %v1629_v34 = vrot.slane %v7870_v22, 1  ;;  %v7871_v43 = vld [vmem:[#allocation2 + $0x28] sm:$0xff] }
 0x120   : > { %v1631_v52 = vrot.slane %v7871_v43, 1  ;;  %v1645_v43 = vrot.slane %v8105_v10, 1  ;;  %v1649_v10 = vrot.slane %v8146_v41, 1 }
 0x121   : > { %v8698_v55 = vsel %vm1621_vm5, %v1627_v26, %v1629_v34 }
 0x122   : > { %v8701_v48 = vsel %vm1621_vm5, %v1629_v34, %v1631_v52 }
 0x124   : > { %6841 = vmatmul.mubr.msk.bf16.vlgmr.msra.gmra.mrb[0].mxu1 %vm483_vm1, %v1626_v28 }
 0x125   : > { %6905 = vmatpush3.bf16.msra.mxu1 %v2369_v57  ;;  %6844 = vmatprep.mubr.msk.bf16.mxu1 %vm483_vm1, %v8684_v17  ;;  %v8735_v57 = vld [vmem:[#allocation2 + $0x50] sm:$0xff] }
 0x126   : > { %7137 = vmatmul.mubr.msk.bf16.gmra.mrb[32].mxu0 %vm483_vm1, %v8456_v45  ;;  %7819 = vmatprep.subr.msk.bf16.mxu1 %vm936_vm0, %v7872_v16  ;;  %v7873_v45 = vld [vmem:[#allocation2 + $0x30] sm:$0xff]  ;;  %v4592_v16 = vshll.u32 %v8565_v60, 16 }
 0x127   : > { %7140 = vmatprep.mubr.msk.bf16.mxu0 %vm483_vm1, %v8469_v6  ;;  %v1633_v20 = vrot.slane %v7873_v45, 1  ;;  %v4597_v45 = vshrl.u32 %v8567_v44, 16 }
 0x129   : > { %v8712_v6 = vsel %vm1621_vm5, %v1631_v52, %v1633_v20  ;;  %v8715_v1 = vsel %vm1621_vm5, %v1633_v20, %v1635_v63  ;;  %v8767_v52 = vld [vmem:[#allocation2 + $0x108] sm:$0xff]  ;;  %v4600_v20 = vshll.u32 %v8567_v44, 16 }
 0x12b   : > { %v4602_v0 = vrot.slane %v4600_v20, 3 }
 0x12c   : > { %6845 = vmatmul.mubr.msk.bf16.gmra.mrb[4].mxu1 %vm483_vm1, %v8698_v55 }
 0x12d   : > { %6848 = vmatprep.mubr.msk.bf16.mxu1 %vm483_vm1, %v8701_v48 }
 0x12e   : > { %7141 = vmatmul.mubr.msk.bf16.gmra.mrb[36].mxu0 %vm483_vm1, %v8474_v25  ;;  %v7876_v25 = vld [vmem:[#allocation2 + $0x48] sm:$0xff] }
 0x12f   : > { %7144 = vmatprep.mubr.msk.bf16.mxu0 %vm483_vm1, %v8485_v11  ;;  %v1639_v26 = vrot.slane %v7876_v25, 1  ;;  %v8726_v11 = vsel %vm1621_vm5, %v1635_v63, %v1637_v56  ;;  %v4594_v63 = vrot.slane %v4592_v16, 3  ;;  %v1655_v25 = vrot.slane %v8206_v36, 1 }
 0x131   : > { %v8729_v28 = vsel %vm1621_vm5, %v1637_v56, %v1639_v26  ;;  %v1653_v56 = vrot.slane %v8188_v12, 1 }
 0x134   : > { %6849 = vmatmul.mubr.msk.bf16.gmra.mrb[8].mxu1 %vm483_vm1, %v8712_v6 }
 0x135   : > { %6852 = vmatprep.mubr.msk.bf16.mxu1 %vm483_vm1, %v8715_v1 }
 0x136   : > { %7145 = vmatmul.mubr.msk.bf16.gmra.mrb[40].mxu0 %vm483_vm1, %v8490_v31  ;;  %v1641_v31 = vrot.slane %v8735_v57, 1 }
 0x137   : > { %7148 = vmatprep.mubr.msk.bf16.mxu0 %vm483_vm1, %v8501_v2  ;;  %v1643_v2 = vrot.slane %v8095_v62, 1  ;;  %v1647_v62 = vrot.slane %v8144_v40, 1  ;;  %v1651_v40 = vrot.slane %v8178_v8, 1 }
 0x138   : > { %v8744_v22 = vsel %vm1621_vm5, %v1639_v26, %v1641_v31  ;;  %v4606_v26 = vshrl.u32 %v8580_v58, 16 }
 0x139   : > { %v8747_v34 = vsel %vm1621_vm5, %v1641_v31, %v1643_v2  ;;  %v8783_v41 = vsel %vm1621_vm5, %v1647_v62, %v1649_v10  ;;  %v4609_v31 = vshll.u32 %v8580_v58, 16  ;;  %v8804_v12 = vsel %vm1621_vm5, %v1651_v40, %v1653_v56 }
 0x13b   : > { %v4611_v16 = vrot.slane %v4609_v31, 3 }
 0x13c   : > { %6853 = vmatmul.mubr.msk.bf16.gmra.mrb[12].mxu1 %vm483_vm1, %v8726_v11 }
 0x13d   : > { %6856 = vmatprep.mubr.msk.bf16.mxu1 %vm483_vm1, %v8729_v28 }
 0x13e   : > { %7149 = vmatmul.mubr.msk.bf16.gmra.mrb[44].mxu0 %vm483_vm1, %v8506_v53  ;;  %v8760_v53 = vsel %vm1621_vm5, %v1643_v2, %v1645_v43 }
 0x13f   : > { %7152 = vmatprep.mubr.msk.bf16.mxu0 %vm483_vm1, %v8517_v9  ;;  %v8763_v9 = vsel %vm1621_vm5, %v1645_v43, %v1647_v62  ;;  %v4615_v62 = vshrl.u32 %v8584_v30, 16 }
 0x141   : > { %v4617_v20 = vrot.slane %v4615_v62, 2 }
 0x144   : > { %6857 = vmatmul.mubr.msk.bf16.gmra.mrb[16].mxu1 %vm483_vm1, %v8744_v22 }
 0x145   : > { %6860 = vmatprep.mubr.msk.bf16.mxu1 %vm483_vm1, %v8747_v34 }
 0x146   : > { %7153 = vmatmul.mubr.msk.bf16.gmra.mrb[48].mxu0 %vm483_vm1, %v8522_v15  ;;  %v4128_v15 = vrot.slane %v8767_v52, 2 }
 0x147   : > { %7156 = vmatprep.mubr.msk.bf16.mxu0 %vm483_vm1, %v8533_v7  ;;  %v4589_v7 = vshrl.u32 %v8565_v60, 16  ;;  %v4599_v60 = vrot.slane %v4597_v45, 2 }
 0x148   : > { %v4129_v8 = vsel %vm3481_vm4, %v8550_v42, %v4128_v15 }
 0x149   : > { %v4591_v32 = vrot.slane %v4589_v7, 2  ;;  %v4603_v43 = vor.u32 %v4602_v0, %v4599_v60  ;;  %v4608_v7 = vrot.slane %v4606_v26, 2  ;;  %v4633_v0 = vshrl.u32 %v8600_v51, 16 }
 0x14b   : > { %v4595_v2 = vor.u32 %v4594_v63, %v4591_v32  ;;  %v4624_v32 = vshrl.u32 %v8596_v29, 16  ;;  %v4627_v63 = vshll.u32 %v8596_v29, 16 }
 0x14c   : > { %6861 = vmatmul.mubr.msk.bf16.gmra.mrb[20].mxu1 %vm483_vm1, %v8760_v53 }
 0x14d   : > { %6864 = vmatprep.mubr.msk.bf16.mxu1 %vm483_vm1, %v8763_v9  ;;  %v4604_v45 = vsel %vm4587_vm6, %v4595_v2, %v4603_v43  ;;  %v4626_v26 = vrot.slane %v4624_v32, 2  ;;  %v4629_v31 = vrot.slane %v4627_v63, 3  ;;  %v5504_v2 = vsel %vm936_vm0, %v8605_v37, 0 }
 0x14e   : > { %7157 = vmatmul.mubr.msk.bf16.gmra.mrb[52].mxu0 %vm483_vm1, %v8538_v39  ;;  %v8786_v39 = vsel %vm1621_vm5, %v1649_v10, %v1651_v40  ;;  %v4618_v10 = vshll.u32 %v8584_v30, 16  ;;  %v1657_v40 = vrot.slane %v8221_v61, 1  ;;  %v4645_v37 = vshll.u32 %v8617_v23, 16 }
 0x14f   : > { %7160 = vmatprep.mubr.msk.bf16.mxu0 %vm483_vm1, %v8554_v59  ;;  %v4031_v59 = vld [vmem:[#allocation2 + $0x110] sm:$0x3] }
 0x150   : > { %v4130_v42 = vrot.slane %v4031_v59, 2  ;;  %v1659_v59 = vrot.slane %v8227_v4, 1  ;;  %v4647_v32 = vrot.slane %v4645_v37, 3 }
 0x152   : > { %v4131_v36 = vsel %vm3481_vm4, %v4128_v15, %v4130_v42  ;;  %v4612_v15 = vor.u32 %v4611_v16, %v4608_v7  ;;  %v8824_v42 = vsel %vm1621_vm5, %v1655_v25, %v1657_v40  ;;  %v8827_v61 = vsel %vm1621_vm5, %v1657_v40, %v1659_v59 }
 0x153   : > { %v4630_v7 = vor.u32 %v4629_v31, %v4626_v26  ;;  %v4642_v16 = vshrl.u32 %v8617_v23, 16  ;;  %v4660_v26 = vshrl.u32 %v8735_v57, 16  ;;  %v4663_v31 = vshll.u32 %v8735_v57, 16 }
 0x154   : > { %6865 = vmatmul.mubr.msk.bf16.gmra.mrb[24].mxu1 %vm483_vm1, %v8783_v41  ;;  %v4613_v4 = vsel %vm4587_vm6, %v4603_v43, %v4612_v15  ;;  %v1663_v43 = vrot.slane %v8245_v24, 1 }
 0x155   : > { %6868 = vmatprep.mubr.msk.bf16.mxu1 %vm483_vm1, %v8786_v39 }
 0x156   : > { %7161 = vmatmul.mubr.msk.bf16.gmra.mrb[56].mxu0 %vm483_vm1, %v8561_v33  ;;  %v8807_v33 = vsel %vm1621_vm5, %v1653_v56, %v1655_v25  ;;  %v4636_v56 = vshll.u32 %v8600_v51, 16  ;;  %v1661_v25 = vrot.slane %v8240_v27, 1 }
 0x157   : > { %7164 = vmatprep.mubr.msk.bf16.mxu0 %vm483_vm1, %v4129_v8  ;;  %v4620_v8 = vrot.slane %v4618_v10, 3  ;;  %v4635_v10 = vrot.slane %v4633_v0, 2 }
 0x158   : > { %v8846_v40 = vsel %vm1621_vm5, %v1659_v59, %v1661_v25  ;;  %v8849_v27 = vsel %vm1621_vm5, %v1661_v25, %v1663_v43  ;;  %v1665_v59 = vrot.slane %v8260_v49, 1 }
 0x159   : > { %v4621_v60 = vor.u32 %v4620_v8, %v4617_v20  ;;  %v4651_v20 = vshrl.u32 %v8621_v21, 16  ;;  %v4654_v8 = vshll.u32 %v8621_v21, 16 }
 0x15a   : > { %v8868_v49 = vsel %vm1621_vm5, %v1663_v43, %v1665_v59  ;;  %v1669_v43 = vrot.slane %v8285_v14, 1 }
 0x15b   : > { %v4622_v62 = vsel %vm4587_vm6, %v4612_v15, %v4621_v60  ;;  %v4631_v24 = vsel %vm4587_vm6, %v4621_v60, %v4630_v7  ;;  %v4644_v15 = vrot.slane %v4642_v16, 2  ;;  %v4653_v0 = vrot.slane %v4651_v20, 2 }
 0x15c   : > { %6869 = vmatmul.mubr.msk.bf16.gmra.mrb[28].mxu1 %vm483_vm1, %v8804_v12  ;;  %v4665_v16 = vrot.slane %v4663_v31, 3 }
 0x15d   : > { %6872 = vmatprep.mubr.msk.bf16.mxu1 %vm483_vm1, %v8807_v33  ;;  %v4648_v60 = vor.u32 %v4647_v32, %v4644_v15  ;;  %v8883_v15 = vld [vmem:[#allocation2 + $0x60] sm:$0xff] }
 0x15e   : > { %7165 = vmatmul.mubr.msk.bf16.gmra.mrb[60].mxu0 %vm483_vm1, %v4131_v36  ;;  %v4638_v36 = vrot.slane %v4636_v56, 3  ;;  %v4656_v56 = vrot.slane %v4654_v8, 3  ;;  %v4678_v32 = vshrl.u32 %v8883_v15, 16 }
 0x15f   : > { %7170 = vmatprep.mubr.msk.bf16.mxu0 %vm483_vm1, %v4604_v45 }
 0x160   : > { %v4639_v45 = vor.u32 %v4638_v36, %v4635_v10  ;;  %v4680_v31 = vrot.slane %v4678_v32, 2 }
 0x162   : > { %v4640_v63 = vsel %vm4587_vm6, %v4630_v7, %v4639_v45  ;;  %v4662_v7 = vrot.slane %v4660_v26, 2 }
 0x164   : > { %6873 = vmatmul.mubr.msk.bf16.gmra.mrb[32].mxu1 %vm483_vm1, %v8824_v42 }
 0x165   : > { %6876 = vmatprep.mubr.msk.bf16.mxu1 %vm483_vm1, %v8827_v61 }
 0x166   : > { %7171 = vmatmul.mubr.msk.bf16.vlgmr.msra.gmra.mrb[0].mxu0 %vm483_vm1, %v4613_v4  ;;  %v1667_v4 = vrot.slane %v8270_v50, 1  ;;  %v4649_v50 = vsel %vm4587_vm6, %v4639_v45, %v4648_v60  ;;  %v4666_v45 = vor.u32 %v4665_v16, %v4662_v7  ;;  %v1675_v16 = vrot.slane %v8308_v47, 1 }
 0x167   : > { %7235 = vmatpush3.bf16.msra.mxu0 %v5504_v2  ;;  %7174 = vmatprep.mubr.msk.bf16.mxu0 %vm483_vm1, %v4622_v62  ;;  %v4657_v2 = vor.u32 %v4656_v56, %v4653_v0  ;;  %v8863_v62 = vld [vmem:[#allocation2 + $0x58] sm:$0xff]  ;;  %v8887_v56 = vld [vmem:[#allocation2 + $0x68] sm:$0xff] }
 0x168   : > { %v4669_v10 = vshrl.u32 %v8863_v62, 16  ;;  %v4672_v36 = vshll.u32 %v8863_v62, 16  ;;  %v8871_v25 = vsel %vm1621_vm5, %v1665_v59, %v1667_v4  ;;  %v4687_v59 = vshrl.u32 %v8887_v56, 16 }
 0x169   : > { %v4658_v37 = vsel %vm4587_vm6, %v4648_v60, %v4657_v2  ;;  %v4690_v14 = vshll.u32 %v8887_v56, 16  ;;  %v8892_v60 = vsel %vm1621_vm5, %v1667_v4, %v1669_v43  ;;  %v4667_v26 = vsel %vm4587_vm6, %v4657_v2, %v4666_v45 }
 0x16a   : > { %v4671_v20 = vrot.slane %v4669_v10, 2  ;;  %v4674_v8 = vrot.slane %v4672_v36, 3  ;;  %v1673_v4 = vrot.slane %v8303_v38, 1 }
 0x16b   : > { %v4692_v7 = vrot.slane %v4690_v14, 3 }
 0x16c   : > { %6877 = vmatmul.mubr.msk.bf16.gmra.mrb[36].mxu1 %vm483_vm1, %v8846_v40  ;;  %v4675_v0 = vor.u32 %v4674_v8, %v4671_v20  ;;  %v8919_v47 = vsel %vm1621_vm5, %v1673_v4, %v1675_v16 }
 0x16d   : > { %6880 = vmatprep.mubr.msk.bf16.mxu1 %vm483_vm1, %v8849_v27 }
 0x16e   : > { %7175 = vmatmul.mubr.msk.bf16.gmra.mrb[4].mxu0 %vm483_vm1, %v4631_v24  ;;  %v1671_v24 = vrot.slane %v8290_v13, 1  ;;  %v4676_v36 = vsel %vm4587_vm6, %v4666_v45, %v4675_v0  ;;  %v8911_v45 = vld [vmem:[#allocation2 + $0x78] sm:$0xff] }
 0x16f   : > { %7178 = vmatprep.mubr.msk.bf16.mxu0 %vm483_vm1, %v4640_v63  ;;  %v4681_v63 = vshll.u32 %v8883_v15, 16  ;;  %v4705_v32 = vshrl.u32 %v8911_v45, 16  ;;  %v4708_v38 = vshll.u32 %v8911_v45, 16 }
 0x170   : > { %v8895_v13 = vsel %vm1621_vm5, %v1669_v43, %v1671_v24 }
 0x171   : > { %v4683_v10 = vrot.slane %v4681_v63, 3  ;;  %v8916_v63 = vsel %vm1621_vm5, %v1671_v24, %v1673_v4  ;;  %v1677_v24 = vrot.slane %v8326_v5, 1 }
 0x173   : > { %v4684_v2 = vor.u32 %v4683_v10, %v4680_v31  ;;  %v4707_v10 = vrot.slane %v4705_v32, 2 }
 0x174   : > { %6881 = vmatmul.mubr.msk.bf16.gmra.mrb[40].mxu1 %vm483_vm1, %v8868_v49 }
 0x175   : > { %6884 = vmatprep.mubr.msk.bf16.mxu1 %vm483_vm1, %v8871_v25 }
 0x176   : > { %7179 = vmatmul.mubr.msk.bf16.gmra.mrb[8].mxu0 %vm483_vm1, %v4649_v50  ;;  %v4689_v50 = vrot.slane %v4687_v59, 2  ;;  %v4685_v59 = vsel %vm4587_vm6, %v4675_v0, %v4684_v2 }
 0x177   : > { %7182 = vmatprep.mubr.msk.bf16.mxu0 %vm483_vm1, %v4658_v37  ;;  %v8907_v37 = vld [vmem:[#allocation2 + $0x70] sm:$0xff] }
 0x178   : > { %v4696_v20 = vshrl.u32 %v8907_v37, 16  ;;  %v4699_v8 = vshll.u32 %v8907_v37, 16  ;;  %v4693_v43 = vor.u32 %v4692_v7, %v4689_v50  ;;  %v1679_v50 = vrot.slane %v8332_v18, 1  ;;  %v8931_v7 = vld [vmem:[#allocation2 + $0x80] sm:$0xff] }
 0x179   : > { %v4714_v4 = vshrl.u32 %v8931_v7, 16 }
 0x17a   : > { %v4698_v14 = vrot.slane %v4696_v20, 2  ;;  %v4694_v31 = vsel %vm4587_vm6, %v4684_v2, %v4693_v43  ;;  %v4717_v2 = vshll.u32 %v8931_v7, 16  ;;  %v8943_v18 = vsel %vm1621_vm5, %v1677_v24, %v1679_v50 }
 0x17c   : > { %6885 = vmatmul.mubr.msk.bf16.gmra.mrb[44].mxu1 %vm483_vm1, %v8892_v60 }
 0x17d   : > { %6888 = vmatprep.mubr.msk.bf16.mxu1 %vm483_vm1, %v8895_v13 }
 0x17e   : > { %7183 = vmatmul.mubr.msk.bf16.gmra.mrb[12].mxu0 %vm483_vm1, %v4667_v26  ;;  %v4701_v26 = vrot.slane %v4699_v8, 3  ;;  %v8935_v8 = vld [vmem:[#allocation2 + $0x88] sm:$0xff] }
 0x17f   : > { %7186 = vmatprep.mubr.msk.bf16.mxu0 %vm483_vm1, %v4676_v36  ;;  %v4710_v36 = vrot.slane %v4708_v38, 3  ;;  %9625 = vst [vmem:[#allocation15_spill] sm:$0xff] %v8935_v8  ;;  %v4723_v32 = vshrl.u32 %v8935_v8, 16  ;;  %v4726_v5 = vshll.u32 %v8935_v8, 16  ;;  %v8940_v38 = vsel %vm1621_vm5, %v1675_v16, %v1677_v24 }
 0x180   : > { %v4702_v0 = vor.u32 %v4701_v26, %v4698_v14  ;;  %v4716_v14 = vrot.slane %v4714_v4, 2  ;;  %v4719_v26 = vrot.slane %v4717_v2, 3  ;;  %v1681_v16 = vrot.slane %v8360_v35, 1  ;;  %v8957_v4 = vld [vmem:[#allocation2 + $0x90] sm:$0xff] }
 0x181   : > { %v4711_v20 = vor.u32 %v4710_v36, %v4707_v10  ;;  %v4725_v10 = vrot.slane %v4723_v32, 2  ;;  %v4728_v36 = vrot.slane %v4726_v5, 3  ;;  %v8954_v24 = vrot.slane %v8369_v46, 1  ;;  %9626 = vst [vmem:[#allocation16_spill] sm:$0xff] %v8957_v4  ;;  %v8961_v5 = vld [vmem:[#allocation2 + $0x98] sm:$0xff] }
 0x182   : > { %v9589_v2 = vshrl.u32 %v8957_v4, 16  ;;  %9627 = vst [vmem:[#allocation17_spill] sm:$0xff] %v8961_v5  ;;  %v9592_v8 = vshrl.u32 %v8961_v5, 16  ;;  %v9595_v35 = vshll.u32 %v8961_v5, 16 }
 0x183   : > { %v4729_v32 = vor.u32 %v4728_v36, %v4725_v10  ;;  %v8970_v46 = vsel %vm1621_vm5, %v1681_v16, %v8954_v24 }
 0x184   : > { %6889 = vmatmul.mubr.msk.bf16.gmra.mrb[48].mxu1 %vm483_vm1, %v8916_v63  ;;  %9628 = vst [vmem:[#allocation18_spill] sm:$0xff] %v8970_v46  ;;  %v4746_v36 = vrot.slane %v9595_v35, 3  ;;  %v8993_v35 = vld [vmem:[#allocation2 + $0xa8] sm:$0xff] }
 0x185   : > { %6892 = vmatprep.mubr.msk.bf16.mxu1 %vm483_vm1, %v8919_v47 }
 0x186   : > { %7187 = vmatmul.mubr.msk.bf16.gmra.mrb[16].mxu0 %vm483_vm1, %v4685_v59  ;;  %v4703_v59 = vsel %vm4587_vm6, %v4693_v43, %v4702_v0  ;;  %v4720_v43 = vor.u32 %v4719_v26, %v4716_v14  ;;  %v4734_v26 = vrot.slane %v9589_v2, 2 }
 0x187   : > { %7190 = vmatprep.mubr.msk.bf16.mxu0 %vm483_vm1, %v4694_v31  ;;  %v4712_v31 = vsel %vm4587_vm6, %v4702_v0, %v4711_v20  ;;  %v9588_v0 = vshll.u32 %v8957_v4, 16  ;;  %v8989_v4 = vld [vmem:[#allocation2 + $0xa0] sm:$0xff] }
 0x188   : > { %v4721_v14 = vsel %vm4587_vm6, %v4711_v20, %v4720_v43  ;;  %v4730_v10 = vsel %vm4587_vm6, %v4720_v43, %v4729_v32  ;;  %v1685_v20 = vrot.slane %v8400_v19, 1  ;;  %v9610_v43 = vshrl.u32 %v8989_v4, 16 }
 0x189   : > { %v9599_v19 = vshll.u32 %v8993_v35, 16 }
 0x18c   : > { %6893 = vmatmul.mubr.msk.bf16.gmra.mrb[52].mxu1 %vm483_vm1, %v8940_v38 }
 0x18d   : > { %6896 = vmatprep.mubr.msk.bf16.mxu1 %vm483_vm1, %v8943_v18 }
 0x18e   : > { %7191 = vmatmul.mubr.msk.bf16.gmra.mrb[20].mxu0 %vm483_vm1, %v4703_v59  ;;  %v8966_v59 = vsel %vm1621_vm5, %v1679_v50, %v1681_v16  ;;  %v4743_v50 = vrot.slane %v9592_v8, 2  ;;  %v7887_v16 = vld [vmem:[#allocation2 + $0x8] sm:$0xfe]  ;;  %v9597_v8 = vshll.u32 %v8989_v4, 16 }
 0x18f   : > { %7194 = vmatprep.mubr.msk.bf16.mxu0 %vm483_vm1, %v4712_v31  ;;  %v4737_v31 = vrot.slane %v9588_v0, 3  ;;  %v2207_v0 = vrot.slane %v7887_v16, 1 }
 0x190   : > { %v4747_v5 = vor.u32 %v4746_v36, %v4743_v50  ;;  %v4755_v50 = vrot.slane %v9597_v8, 3  ;;  %v9019_v8 = vld [vmem:[#allocation2 + $0xb8] sm:$0xff] }
 0x191   : > { %v4738_v2 = vor.u32 %v4737_v31, %v4734_v26  ;;  %v4752_v31 = vrot.slane %v9610_v43, 2  ;;  %v9633_v43 = vld [vmem:[#allocation10_spill] sm:$0xff] }
 0x193   : > { %v4739_v26 = vsel %vm4587_vm6, %v4729_v32, %v4738_v2  ;;  %v4748_v36 = vsel %vm4587_vm6, %v4738_v2, %v4747_v5 }
 0x194   : > { %6897 = vmatmul.mubr.msk.bf16.gmra.mrb[56].mxu1 %vm483_vm1, %v8966_v59 }
 0x195   : > { %6900 = vmatprep.mubr.msk.bf16.mxu1 %vm483_vm1, %v8970_v46  ;;  %v9598_v46 = vshrl.u32 %v8993_v35, 16 }
 0x196   : > { %7195 = vmatmul.mubr.msk.bf16.gmra.mrb[24].mxu0 %vm483_vm1, %v4721_v14  ;;  %v1686_v14 = vsel %vm1621_vm5, %v8954_v24, %v1685_v20  ;;  %v4764_v20 = vrot.slane %v9599_v19, 3  ;;  %v9602_v19 = vshll.u32 %v9019_v8, 16 }
 0x197   : > { %7198 = vmatprep.mubr.msk.bf16.mxu0 %vm483_vm1, %v4730_v10  ;;  %v2209_v10 = vsel %vm1621_vm5, %v2207_v0, %v8672_v54  ;;  %v4761_v16 = vrot.slane %v9598_v46, 2  ;;  %v4756_v54 = vor.u32 %v4755_v50, %v4752_v31  ;;  %v9015_v0 = vld [vmem:[#allocation2 + $0xb0] sm:$0xff]  ;;  %v9600_v46 = vshrl.u32 %v9019_v8, 16 }
 0x198   : > { %v9609_v32 = vshrl.u32 %v9015_v0, 16 }
 0x199   : > { %v4765_v2 = vor.u32 %v4764_v20, %v4761_v16  ;;  %v4782_v16 = vrot.slane %v9602_v19, 3  ;;  %v9040_v20 = vld [vmem:[#allocation2 + $0xc0] sm:$0xff] }
 0x19b   : > { %v4766_v50 = vsel %vm4587_vm6, %v4756_v54, %v4765_v2 }
 0x19c   : > { %6901 = vmatmul.mubr.msk.bf16.gmra.mrb[60].mxu1 %vm483_vm1, %v1686_v14  ;;  %v9601_v14 = vshll.u32 %v9015_v0, 16 }
 0x19d   : > { %6906 = vmatprep.mubr.msk.bf16.mxu1 %vm483_vm1, %v2209_v10  ;;  %v4757_v10 = vsel %vm4587_vm6, %v4747_v5, %v4756_v54  ;;  %v9603_v54 = vshll.u32 %v9040_v20, 16 }
 0x19e   : > { %7199 = vmatmul.mubr.msk.bf16.gmra.mrb[28].mxu0 %vm483_vm1, %v4739_v26  ;;  %v4770_v26 = vrot.slane %v9609_v32, 2  ;;  %v4773_v31 = vrot.slane %v9601_v14, 3  ;;  %v9044_v14 = vld [vmem:[#allocation2 + $0xc8] sm:$0xff] }
 0x19f   : > { %7202 = vmatprep.mubr.msk.bf16.mxu0 %vm483_vm1, %v4748_v36  ;;  %v4779_v36 = vrot.slane %v9600_v46, 2  ;;  %v9604_v19 = vshrl.u32 %v9044_v14, 16 }
 0x1a0   : > { %v4774_v5 = vor.u32 %v4773_v31, %v4770_v26  ;;  %v4791_v26 = vrot.slane %v9603_v54, 3 }
 0x1a1   : > { %v4783_v46 = vor.u32 %v4782_v16, %v4779_v36  ;;  %v9064_v16 = vld [vmem:[#allocation2 + $0xd0] sm:$0xff] }
 0x1a3   : > { %v4784_v31 = vsel %vm4587_vm6, %v4774_v5, %v4783_v46 }
 0x1a4   : > { %6907 = vmatmul.mubr.msk.bf16.vlgmr.msra.gmra.mrb[0].mxu1 %vm483_vm1, %v8684_v17  ;;  %v9606_v17 = vshrl.u32 %v9040_v20, 16 }
 0x1a5   : > { %7301 = vmatpush3.bf16.msra.mxu1 %v7956_v3  ;;  %6910 = vmatprep.mubr.msk.bf16.mxu1 %vm483_vm1, %v8698_v55  ;;  %v9605_v3 = vshll.u32 %v9044_v14, 16  ;;  %v4775_v55 = vsel %vm4587_vm6, %v4765_v2, %v4774_v5  ;;  %v9607_v5 = vshll.u32 %v9064_v16, 16 }
 0x1a6   : > { %7203 = vmatmul.mubr.msk.bf16.gmra.mrb[32].mxu0 %vm483_vm1, %v4757_v10  ;;  %v4788_v10 = vrot.slane %v9606_v17, 2 }
 0x1a7   : > { %7206 = vmatprep.mubr.msk.bf16.mxu0 %vm483_vm1, %v4766_v50  ;;  %v4797_v50 = vrot.slane %v9604_v19, 2  ;;  %v4800_v36 = vrot.slane %v9605_v3, 3 }
 0x1a8   : > { %v4792_v2 = vor.u32 %v4791_v26, %v4788_v10  ;;  %v9629_v10 = vld [vmem:[#allocation6_spill] sm:$0xff] }
 0x1a9   : > { %v4801_v54 = vor.u32 %v4800_v36, %v4797_v50  ;;  %v4815_v26 = vrot.slane %v9629_v10, 2 }
 0x1aa   : > { %v4793_v19 = vsel %vm4587_vm6, %v4783_v46, %v4792_v2 }
 0x1ac   : > { %6911 = vmatmul.mubr.msk.bf16.gmra.mrb[4].mxu1 %vm483_vm1, %v8701_v48  ;;  %v9608_v48 = vshrl.u32 %v9064_v16, 16 }
 0x1ad   : > { %6914 = vmatprep.mubr.msk.bf16.mxu1 %vm483_vm1, %v8712_v6  ;;  %v4809_v6 = vrot.slane %v9607_v5, 3  ;;  %v9631_v5 = vld [vmem:[#allocation7_spill] sm:$0xff] }
 0x1ae   : > { %7207 = vmatmul.mubr.msk.bf16.gmra.mrb[36].mxu0 %vm483_vm1, %v4775_v55  ;;  %v4806_v3 = vrot.slane %v9608_v48, 2  ;;  %v4802_v55 = vsel %vm4587_vm6, %v4792_v2, %v4801_v54  ;;  %v4824_v48 = vrot.slane %v9631_v5, 2 }
 0x1af   : > { %7210 = vmatprep.mubr.msk.bf16.mxu0 %vm483_vm1, %v4784_v31  ;;  %v9630_v31 = vld [vmem:[#allocation4_spill] sm:$0xff] }
 0x1b0   : > { %v4818_v17 = vrot.slane %v9630_v31, 3  ;;  %v4810_v46 = vor.u32 %v4809_v6, %v4806_v3  ;;  %v4833_v31 = vrot.slane %v9633_v43, 2  ;;  %v9635_v3 = vld [vmem:[#allocation11_spill] sm:$0xff] }
 0x1b1   : > { %v4842_v6 = vrot.slane %v9635_v3, 2 }
 0x1b2   : > { %v4819_v50 = vor.u32 %v4818_v17, %v4815_v26  ;;  %v4811_v36 = vsel %vm4587_vm6, %v4801_v54, %v4810_v46 }
 0x1b4   : > { %6915 = vmatmul.mubr.msk.bf16.gmra.mrb[8].mxu1 %vm483_vm1, %v8715_v1  ;;  %v9632_v1 = vld [vmem:[#allocation5_spill] sm:$0xff]  ;;  %v4820_v2 = vsel %vm4587_vm6, %v4810_v46, %v4819_v50 }
 0x1b5   : > { %6918 = vmatprep.mubr.msk.bf16.mxu1 %vm483_vm1, %v8726_v11  ;;  %v4827_v32 = vrot.slane %v9632_v1, 3  ;;  %v9634_v11 = vld [vmem:[#allocation8_spill] sm:$0xff]  ;;  %v9637_v46 = vld [vmem:[#allocation13_spill] sm:$0xff] }
 0x1b6   : > { %7211 = vmatmul.mubr.msk.bf16.gmra.mrb[40].mxu0 %vm483_vm1, %v4793_v19  ;;  %v4836_v10 = vrot.slane %v9634_v11, 3  ;;  %v4851_v11 = vrot.slane %v9637_v46, 2 }
 0x1b7   : > { %7214 = vmatprep.mubr.msk.bf16.mxu0 %vm483_vm1, %v4802_v55  ;;  %v4828_v19 = vor.u32 %v4827_v32, %v4824_v48  ;;  %v9639_v48 = vld [vmem:[#allocation14_spill] sm:$0xff] }
 0x1b8   : > { %v4837_v17 = vor.u32 %v4836_v10, %v4833_v31  ;;  %v4858_v10 = vshrl.u32 %v9639_v48, 16  ;;  %v9611_v31 = vshll.u32 %v9639_v48, 16 }
 0x1b9   : > { %v4829_v54 = vsel %vm4587_vm6, %v4819_v50, %v4828_v19 }
 0x1ba   : > { %v4838_v26 = vsel %vm4587_vm6, %v4828_v19, %v4837_v17  ;;  %v4860_v19 = vrot.slane %v4858_v10, 2 }
 0x1bc   : > { %6919 = vmatmul.mubr.msk.bf16.gmra.mrb[12].mxu1 %vm483_vm1, %v8729_v28  ;;  %v9636_v28 = vld [vmem:[#allocation9_spill] sm:$0xff] }
 0x1bd   : > { %6922 = vmatprep.mubr.msk.bf16.mxu1 %vm483_vm1, %v8744_v22  ;;  %v4845_v55 = vrot.slane %v9636_v28, 3  ;;  %v9638_v22 = vld [vmem:[#allocation12_spill] sm:$0xff] }
 0x1be   : > { %7215 = vmatmul.mubr.msk.bf16.gmra.mrb[44].mxu0 %vm483_vm1, %v4811_v36  ;;  %v4854_v43 = vrot.slane %v9638_v22, 3  ;;  %v4870_v36 = vshll.u32 %v8767_v52, 16 }
 0x1bf   : > { %7218 = vmatprep.mubr.msk.bf16.mxu0 %vm483_vm1, %v4820_v2  ;;  %v4846_v32 = vor.u32 %v4845_v55, %v4842_v6 }
 0x1c0   : > { %v4855_v50 = vor.u32 %v4854_v43, %v4851_v11  ;;  %v4872_v55 = vrot.slane %v4870_v36, 3  ;;  %v9118_v43 = vld [vmem:[#allocation2 + $0x110] sm:$0x7] }
 0x1c1   : > { %v4847_v2 = vsel %vm4587_vm6, %v4837_v17, %v4846_v32  ;;  %v4876_v17 = vshrl.u32 %v9118_v43, 16 }
 0x1c4   : > { %6923 = vmatmul.mubr.msk.bf16.gmra.mrb[16].mxu1 %vm483_vm1, %v8747_v34  ;;  %v4867_v34 = vshrl.u32 %v8767_v52, 16 }
 0x1c5   : > { %6926 = vmatprep.mubr.msk.bf16.mxu1 %vm483_vm1, %v8760_v53  ;;  %v4863_v53 = vrot.slane %v9611_v31, 3 }
 0x1c6   : > { %7219 = vmatmul.mubr.msk.bf16.gmra.mrb[48].mxu0 %vm483_vm1, %v4829_v54  ;;  %v4856_v54 = vsel %vm4587_vm6, %v4846_v32, %v4855_v50  ;;  %v4869_v6 = vrot.slane %v4867_v34, 2  ;;  %v4878_v32 = vrot.slane %v4876_v17, 2 }
 0x1c7   : > { %7222 = vmatprep.mubr.msk.bf16.mxu0 %vm483_vm1, %v4838_v26  ;;  %v4864_v11 = vor.u32 %v4863_v53, %v4860_v19  ;;  %v4879_v26 = vshll.u32 %v9118_v43, 16  ;;  %v5343_v53 = vrot.slane %v8567_v44, 3 }
 0x1c8   : > { %v4873_v31 = vor.u32 %v4872_v55, %v4869_v6  ;;  %v2171_v55 = vld [vmem:[#allocation2 + $0x108] sm:$0x1] }
 0x1c9   : > { %v4881_v34 = vrot.slane %v4879_v26, 3 }
 0x1ca   : > { %v4874_v36 = vsel %vm4587_vm6, %v4864_v11, %v4873_v31 }
 0x1cc   : > { %6927 = vmatmul.mubr.msk.bf16.gmra.mrb[20].mxu1 %vm483_vm1, %v8763_v9  ;;  %v4865_v9 = vsel %vm4587_vm6, %v4855_v50, %v4864_v11 }
 0x1cd   : > { %6930 = vmatprep.mubr.msk.bf16.mxu1 %vm483_vm1, %v8783_v41  ;;  %v5336_v41 = vld [vmem:[#allocation2 + $0x10] sm:$0xf8] }
 0x1ce   : > { %7223 = vmatmul.mubr.msk.bf16.gmra.mrb[52].mxu0 %vm483_vm1, %v4847_v2  ;;  %v4882_v2 = vor.u32 %v4881_v34, %v4878_v32  ;;  %v5342_v19 = vrot.slane %v5336_v41, 3  ;;  %v9644_v32 = vld [vmem:[#allocation18_spill] sm:$0xff]  ;;  %v9645_v41 = vld [vmem:[#allocation17_spill] sm:$0xff] }
 0x1cf   : > { %7226 = vmatprep.mubr.msk.bf16.mxu0 %vm483_vm1, %v4856_v54  ;;  %v5347_v54 = vrot.slane %v8584_v30, 3 }
 0x1d0   : > { %v4883_v50 = vsel %vm4587_vm6, %v4873_v31, %v4882_v2  ;;  %v9640_v31 = vld [vmem:[#allocation15_spill] sm:$0xff]  ;;  %v5375_v2 = vrot.slane %v9645_v41, 3 }
 0x1d4   : > { %6931 = vmatmul.mubr.msk.bf16.gmra.mrb[24].mxu1 %vm483_vm1, %v8786_v39  ;;  %v5344_v39 = vsel %vm5341_vm7, %v5342_v19, %v5343_v53 }
 0x1d5   : > { %6934 = vmatprep.mubr.msk.bf16.mxu1 %vm483_vm1, %v8804_v12  ;;  %v5345_v12 = vrot.slane %v8580_v58, 3  ;;  %v5351_v58 = vrot.slane %v8600_v51, 3 }
 0x1d6   : > { %7227 = vmatmul.mubr.msk.bf16.gmra.mrb[56].mxu0 %vm483_vm1, %v4865_v9 }
 0x1d7   : > { %7230 = vmatprep.mubr.msk.bf16.mxu0 %vm483_vm1, %v4874_v36  ;;  %v5346_v44 = vsel %vm5341_vm7, %v5343_v53, %v5345_v12  ;;  %v9646_v53 = vshrl.u32 %v9645_v41, 16 }
 0x1dc   : > { %6935 = vmatmul.mubr.msk.bf16.gmra.mrb[28].mxu1 %vm483_vm1, %v8807_v33  ;;  %v5348_v33 = vsel %vm5341_vm7, %v5345_v12, %v5347_v54 }
 0x1dd   : > { %6938 = vmatprep.mubr.msk.bf16.mxu1 %vm483_vm1, %v8824_v42  ;;  %v5349_v42 = vrot.slane %v8596_v29, 3  ;;  %v5355_v29 = vrot.slane %v8621_v21, 3 }
 0x1de   : > { %7231 = vmatmul.mubr.msk.bf16.gmra.mrb[60].mxu0 %vm483_vm1, %v4883_v50  ;;  %v2892_v50 = vrot.slane %v9646_v53, 1  ;;  %v9660_v53 = vshll.u32 %v9044_v14, 16 }
 0x1df   : > { %7236 = vmatprep.mubr.msk.bf16.mxu0 %vm483_vm1, %v5344_v39  ;;  %v5350_v30 = vsel %vm5341_vm7, %v5347_v54, %v5349_v42  ;;  %v9647_v39 = vshll.u32 %v9645_v41, 16  ;;  %v9648_v54 = vld [vmem:[#allocation3_spill] sm:$0xff] }
 0x1e1   : > { %v2895_v12 = vrot.slane %v9647_v39, 2 }
 0x1e4   : > { %6939 = vmatmul.mubr.msk.bf16.gmra.mrb[32].mxu1 %vm483_vm1, %v8827_v61  ;;  %v5352_v61 = vsel %vm5341_vm7, %v5349_v42, %v5351_v58 }
 0x1e5   : > { %6942 = vmatprep.mubr.msk.bf16.mxu1 %vm483_vm1, %v8846_v40  ;;  %v5353_v40 = vrot.slane %v8617_v23, 3  ;;  %v5359_v23 = vrot.slane %v8863_v62, 3 }
 0x1e6   : > { %7237 = vmatmul.mubr.msk.bf16.vlgmr.msra.gmra.mrb[0].mxu0 %vm483_vm1, %v5346_v44 }
 0x1e7   : > { %7240 = vmatprep.mubr.msk.bf16.mxu0 %vm483_vm1, %v5348_v33  ;;  %v5354_v51 = vsel %vm5341_vm7, %v5351_v58, %v5353_v40  ;;  %v9649_v33 = vshrl.u32 %v8989_v4, 16  ;;  %v9650_v58 = vshll.u32 %v8989_v4, 16 }
 0x1e9   : > { %v2901_v42 = vrot.slane %v9649_v33, 1 }
 0x1ec   : > { %6943 = vmatmul.mubr.msk.bf16.gmra.mrb[36].mxu1 %vm483_vm1, %v8849_v27  ;;  %v5356_v27 = vsel %vm5341_vm7, %v5353_v40, %v5355_v29 }
 0x1ed   : > { %6946 = vmatprep.mubr.msk.bf16.mxu1 %vm483_vm1, %v8868_v49  ;;  %v5357_v49 = vrot.slane %v8735_v57, 3  ;;  %v5363_v57 = vrot.slane %v8887_v56, 3 }
 0x1ee   : > { %7241 = vmatmul.mubr.msk.bf16.gmra.mrb[4].mxu0 %vm483_vm1, %v5350_v30  ;;  %v2904_v30 = vrot.slane %v9650_v58, 2 }
 0x1ef   : > { %7244 = vmatprep.mubr.msk.bf16.mxu0 %vm483_vm1, %v5352_v61  ;;  %v5358_v21 = vsel %vm5341_vm7, %v5355_v29, %v5357_v49  ;;  %v2896_v29 = vor.u32 %v2895_v12, %v2892_v50  ;;  %v2949_v50 = vrot.slane %v9660_v53, 2  ;;  %v9661_v12 = vshrl.u32 %v9064_v16, 16 }
 0x1f0   : > { %v5403_v53 = vrot.slane %v8767_v52, 3  ;;  %v5405_v52 = vrot.slane %v9118_v43, 3 }
 0x1f4   : > { %6947 = vmatmul.mubr.msk.bf16.gmra.mrb[40].mxu1 %vm483_vm1, %v8871_v25  ;;  %v5360_v25 = vsel %vm5341_vm7, %v5357_v49, %v5359_v23  ;;  %v5379_v49 = vrot.slane %v8993_v35, 3 }
 0x1f5   : > { %6950 = vmatprep.mubr.msk.bf16.mxu1 %vm483_vm1, %v8892_v60  ;;  %v5361_v60 = vrot.slane %v8883_v15, 3  ;;  %v5367_v15 = vrot.slane %v8911_v45, 3  ;;  %v5371_v45 = vrot.slane %v9640_v31, 3  ;;  %v5383_v31 = vrot.slane %v9019_v8, 3 }
 0x1f6   : > { %7245 = vmatmul.mubr.msk.bf16.gmra.mrb[8].mxu0 %vm483_vm1, %v5354_v51  ;;  %v2905_v51 = vor.u32 %v2904_v30, %v2901_v42  ;;  %v5389_v30 = vrot.slane %v9064_v16, 3 }
 0x1f7   : > { %7248 = vmatprep.mubr.msk.bf16.mxu0 %vm483_vm1, %v5356_v27  ;;  %v5362_v62 = vsel %vm5341_vm7, %v5359_v23, %v5361_v60  ;;  %v5377_v27 = vrot.slane %v8989_v4, 3 }
 0x1f9   : > { %v5378_v4 = vsel %vm5341_vm7, %v5375_v2, %v5377_v27 }
 0x1fc   : > { %6951 = vmatmul.mubr.msk.bf16.gmra.mrb[44].mxu1 %vm483_vm1, %v8895_v13  ;;  %v5364_v13 = vsel %vm5341_vm7, %v5361_v60, %v5363_v57  ;;  %v9652_v60 = vshll.u32 %v8993_v35, 16 }
 0x1fd   : > { %6954 = vmatprep.mubr.msk.bf16.mxu1 %vm483_vm1, %v8916_v63  ;;  %v5365_v63 = vrot.slane %v8907_v37, 3  ;;  %v5369_v37 = vrot.slane %v8931_v7, 3  ;;  %v2270_v7 = vrot.slane %v2171_v55, 1 }
 0x1fe   : > { %7249 = vmatmul.mubr.msk.bf16.gmra.mrb[12].mxu0 %vm483_vm1, %v5358_v21  ;;  %v9651_v21 = vshrl.u32 %v8993_v35, 16 }
 0x1ff   : > { %7252 = vmatprep.mubr.msk.bf16.mxu0 %vm483_vm1, %v5360_v25  ;;  %v5366_v56 = vsel %vm5341_vm7, %v5363_v57, %v5365_v63  ;;  %v5370_v9 = vsel %vm5341_vm7, %v5367_v15, %v5369_v37  ;;  %v5372_v34 = vsel %vm5341_vm7, %v5369_v37, %v5371_v45  ;;  %v2913_v57 = vrot.slane %v9652_v60, 2 }
 0x200   : > { %v2910_v25 = vrot.slane %v9651_v21, 1  ;;  %v5381_v37 = vrot.slane %v9015_v0, 3  ;;  %v2976_v60 = vrot.slane %v9632_v1, 2 }
 0x204   : > { %6955 = vmatmul.mubr.msk.bf16.gmra.mrb[48].mxu1 %vm483_vm1, %v8919_v47  ;;  %v5368_v47 = vsel %vm5341_vm7, %v5365_v63, %v5367_v15  ;;  %v9654_v15 = vshll.u32 %v9015_v0, 16 }
 0x205   : > { %6958 = vmatprep.mubr.msk.bf16.mxu1 %vm483_vm1, %v8940_v38  ;;  %v2268_v38 = vrot.slane %v9639_v48, 1 }
 0x206   : > { %7253 = vmatmul.mubr.msk.bf16.gmra.mrb[16].mxu0 %vm483_vm1, %v5362_v62  ;;  %v2906_v62 = vsel %vm2727_vm3, %v2896_v29, %v2905_v51 }
 0x207   : > { %7256 = vmatprep.mubr.msk.bf16.mxu0 %vm483_vm1, %v5364_v13  ;;  %v2269_v6 = vsel %vm1621_vm5, %v8954_v24, %v2268_v38  ;;  %v2271_v19 = vsel %vm1621_vm5, %v2268_v38, %v2270_v7  ;;  %v9653_v13 = vshrl.u32 %v9015_v0, 16  ;;  %v2914_v38 = vor.u32 %v2913_v57, %v2910_v25 }
 0x208   : > { %v5382_v0 = vsel %vm5341_vm7, %v5379_v49, %v5381_v37  ;;  %v2973_v25 = vrot.slane %v9631_v5, 1 }
 0x209   : > { %v2919_v63 = vrot.slane %v9653_v13, 1 }
 0x20a   : > { %v2977_v13 = vor.u32 %v2976_v60, %v2973_v25 }
 0x20c   : > { %6959 = vmatmul.mubr.msk.bf16.gmra.mrb[52].mxu1 %vm483_vm1, %v8943_v18  ;;  %v9641_v18 = vld [vmem:[#allocation16_spill] sm:$0xff] }
 0x20d   : > { %6962 = vmatprep.mubr.msk.bf16.mxu1 %vm483_vm1, %v8966_v59  ;;  %v9642_v11 = vshrl.u32 %v9641_v18, 16  ;;  %v9643_v26 = vshll.u32 %v9641_v18, 16  ;;  %v5373_v36 = vrot.slane %v9641_v18, 3  ;;  %v9656_v18 = vshll.u32 %v9019_v8, 16 }
 0x20e   : > { %7257 = vmatmul.mubr.msk.bf16.gmra.mrb[20].mxu0 %vm483_vm1, %v5366_v56  ;;  %v2922_v56 = vrot.slane %v9654_v15, 2 }
 0x20f   : > { %7260 = vmatprep.mubr.msk.bf16.mxu0 %vm483_vm1, %v5368_v47  ;;  %v2883_v17 = vrot.slane %v9642_v11, 1  ;;  %v2886_v59 = vrot.slane %v9643_v26, 2  ;;  %v5374_v61 = vsel %vm5341_vm7, %v5371_v45, %v5373_v36  ;;  %v5376_v40 = vsel %vm5341_vm7, %v5373_v36, %v5375_v2 }
 0x210   : > { %v5380_v47 = vsel %vm5341_vm7, %v5377_v27, %v5379_v49  ;;  %v2923_v35 = vor.u32 %v2922_v56, %v2919_v63  ;;  %v2915_v45 = vsel %vm2727_vm3, %v2905_v51, %v2914_v38  ;;  %v2931_v11 = vrot.slane %v9656_v18, 2  ;;  %v9663_v51 = vld [vmem:[#allocation6_spill] sm:$0xff]  ;;  %v9664_v49 = vld [vmem:[#allocation4_spill] sm:$0xff]  ;;  %v7897_v56 = vld [vmem:[#allocation2 + $0xe8] sm:$0xff] }
 0x211   : > { %v2887_v24 = vor.u32 %v2886_v59, %v2883_v17  ;;  %v9657_v26 = vshrl.u32 %v9040_v20, 16  ;;  %v5387_v36 = vrot.slane %v9044_v14, 3  ;;  %v9659_v2 = vshrl.u32 %v9044_v14, 16  ;;  %v7896_v63 = vld [vmem:[#allocation2 + $0xe0] sm:$0xff] }
 0x212   : > { %v2924_v17 = vsel %vm2727_vm3, %v2914_v38, %v2923_v35  ;;  %v2964_v27 = vrot.slane %v9663_v51, 1  ;;  %v5393_v15 = vrot.slane %v7896_v63, 3  ;;  %v5395_v5 = vrot.slane %v7897_v56, 3  ;;  %v9666_v38 = vld [vmem:[#allocation8_spill] sm:$0xff] }
 0x213   : > { %v2888_v44 = vsel %vm2727_vm3, %v9648_v54, %v2887_v24  ;;  %v2897_v23 = vsel %vm2727_vm3, %v2887_v24, %v2896_v29  ;;  %v2937_v59 = vrot.slane %v9657_v26, 1  ;;  %v5385_v24 = vrot.slane %v9040_v20, 3 }
 0x214   : > { %6963 = vmatmul.mubr.msk.bf16.gmra.mrb[56].mxu1 %vm483_vm1, %v9644_v32  ;;  %v2955_v54 = vrot.slane %v9661_v12, 1  ;;  %v5390_v57 = vsel %vm5341_vm7, %v5387_v36, %v5389_v30 }
 0x215   : > { %6966 = vmatprep.mubr.msk.bf16.mxu1 %vm483_vm1, %v2269_v6  ;;  %v9655_v6 = vshrl.u32 %v9019_v8, 16  ;;  %v5388_v42 = vsel %vm5341_vm7, %v5385_v24, %v5387_v36 }
 0x216   : > { %7261 = vmatmul.mubr.msk.bf16.gmra.mrb[24].mxu0 %vm483_vm1, %v5370_v9  ;;  %v9658_v9 = vshll.u32 %v9040_v20, 16  ;;  %v5386_v20 = vsel %vm5341_vm7, %v5383_v31, %v5385_v24 }
 0x217   : > { %7264 = vmatprep.mubr.msk.bf16.mxu0 %vm483_vm1, %v5372_v34  ;;  %v2928_v55 = vrot.slane %v9655_v6, 1  ;;  %v5384_v34 = vsel %vm5341_vm7, %v5381_v37, %v5383_v31  ;;  %v2991_v31 = vrot.slane %v9635_v3, 1 }
 0x218   : > { %v2940_v32 = vrot.slane %v9658_v9, 2  ;;  %v3000_v9 = vrot.slane %v9637_v46, 1  ;;  %v7900_v46 = vld [vmem:[#allocation2 + $0x108] sm:$0x3] }
 0x219   : > { %v2932_v7 = vor.u32 %v2931_v11, %v2928_v55  ;;  %v5396_v55 = vsel %vm5341_vm7, %v5393_v15, %v5395_v5 }
 0x21a   : > { %v2941_v8 = vor.u32 %v2940_v32, %v2937_v59  ;;  %v7899_v59 = vld [vmem:[#allocation2 + $0xf8] sm:$0xff]  ;;  %v3003_v32 = vrot.slane %v9638_v22, 2  ;;  %v3019_v22 = vshll.u32 %v7900_v46, 16 }
 0x21b   : > { %v2933_v41 = vsel %vm2727_vm3, %v2923_v35, %v2932_v7  ;;  %v2985_v35 = vrot.slane %v9666_v38, 2  ;;  %v5399_v3 = vrot.slane %v7899_v59, 3 }
 0x21c   : > { %6967 = vmatmul.mubr.msk.bf16.gmra.mrb[60].mxu1 %vm483_vm1, %v2271_v19  ;;  %v2946_v19 = vrot.slane %v9659_v2, 1  ;;  %v2942_v39 = vsel %vm2727_vm3, %v2932_v7, %v2941_v8  ;;  %v9667_v7 = vshll.u32 %v9639_v48, 16  ;;  %v3016_v2 = vshrl.u32 %v7900_v46, 16 }
 0x21d   : > { %7004 = vmatprep.mubr.msk.bf16.mxu1 %vm483_vm1, %v2888_v44  ;;  %v9662_v44 = vshll.u32 %v9064_v16, 16  ;;  %v3021_v12 = vrot.slane %v3019_v22, 2 }
 0x21e   : > { %7265 = vmatmul.mubr.msk.bf16.gmra.mrb[28].mxu0 %vm483_vm1, %v5374_v61  ;;  %v2950_v58 = vor.u32 %v2949_v50, %v2946_v19  ;;  %v7895_v61 = vld [vmem:[#allocation2 + $0xd8] sm:$0xff] }
 0x21f   : > { %7268 = vmatprep.mubr.msk.bf16.mxu0 %vm483_vm1, %v5376_v40  ;;  %v2958_v33 = vrot.slane %v9662_v44, 2  ;;  %v5391_v40 = vrot.slane %v7895_v61, 3 }
 0x220   : > { %v2951_v29 = vsel %vm2727_vm3, %v2941_v8, %v2950_v58  ;;  %v3012_v8 = vrot.slane %v9667_v7, 2 }
 0x221   : > { %v2959_v14 = vor.u32 %v2958_v33, %v2955_v54  ;;  %v5392_v16 = vsel %vm5341_vm7, %v5389_v30, %v5391_v40  ;;  %v5394_v6 = vsel %vm5341_vm7, %v5391_v40, %v5393_v15 }
 0x223   : > { %v2960_v21 = vsel %vm2727_vm3, %v2950_v58, %v2959_v14  ;;  %v5406_v58 = vsel %vm5341_vm7, %v5403_v53, %v5405_v52 }
 0x224   : > { %7005 = vmatmul.mubr.msk.bf16.vlgmr.msra.gmra.mrb[32].mxu1 %vm483_vm1, %v2897_v23  ;;  %v2967_v23 = vrot.slane %v9664_v49, 2 }
 0x225   : > { %7008 = vmatprep.mubr.msk.bf16.mxu1 %vm483_vm1, %v2906_v62 }
 0x226   : > { %7269 = vmatmul.mubr.msk.bf16.gmra.mrb[32].mxu0 %vm483_vm1, %v5378_v4  ;;  %v2968_v62 = vor.u32 %v2967_v23, %v2964_v27  ;;  %v9665_v4 = vld [vmem:[#allocation10_spill] sm:$0xff] }
 0x227   : > { %7272 = vmatprep.mubr.msk.bf16.mxu0 %vm483_vm1, %v5380_v47  ;;  %v2982_v47 = vrot.slane %v9665_v4, 1 }
 0x228   : > { %v2969_v1 = vsel %vm2727_vm3, %v2959_v14, %v2968_v62  ;;  %v2978_v37 = vsel %vm2727_vm3, %v2968_v62, %v2977_v13 }
 0x229   : > { %v2986_v18 = vor.u32 %v2985_v35, %v2982_v47 }
 0x22c   : > { %7009 = vmatmul.mubr.msk.bf16.gmra.mrb[36].mxu1 %vm483_vm1, %v2915_v45  ;;  %v2994_v45 = vrot.slane %v9636_v28, 2  ;;  %v2987_v28 = vsel %vm2727_vm3, %v2977_v13, %v2986_v18 }
 0x22d   : > { %7012 = vmatprep.mubr.msk.bf16.mxu1 %vm483_vm1, %v2924_v17  ;;  %v7898_v17 = vld [vmem:[#allocation2 + $0xf0] sm:$0xff] }
 0x22e   : > { %7273 = vmatmul.mubr.msk.bf16.gmra.mrb[36].mxu0 %vm483_vm1, %v5382_v0  ;;  %v2995_v11 = vor.u32 %v2994_v45, %v2991_v31  ;;  %v5397_v26 = vrot.slane %v7898_v17, 3  ;;  %v9397_v17 = vld [vmem:[%s9562_s3] ss:$0 sm:$0xff] }
 0x22f   : > { %7276 = vmatprep.mubr.msk.bf16.mxu0 %vm483_vm1, %v5384_v34  ;;  %v3009_v34 = vrot.slane %v4858_v10, 1  ;;  %v7901_v10 = vld [vmem:[#allocation2 + $0x100] sm:$0xff] }
 0x230   : > { %v2996_v0 = vsel %vm2727_vm3, %v2986_v18, %v2995_v11  ;;  %v5398_v24 = vsel %vm5341_vm7, %v5395_v5, %v5397_v26  ;;  %v5400_v36 = vsel %vm5341_vm7, %v5397_v26, %v5399_v3  ;;  %v5401_v48 = vrot.slane %v7901_v10, 3 }
 0x231   : > { %v3013_v19 = vor.u32 %v3012_v8, %v3009_v34 }
 0x232   : > { %v5402_v44 = vsel %vm5341_vm7, %v5399_v3, %v5401_v48  ;;  %v5404_v33 = vsel %vm5341_vm7, %v5401_v48, %v5403_v53 }
 0x234   : > { %7013 = vmatmul.mubr.msk.bf16.gmra.mrb[40].mxu1 %vm483_vm1, %v2933_v41  ;;  %v3004_v41 = vor.u32 %v3003_v32, %v3000_v9 }
 0x235   : > { %7016 = vmatprep.mubr.msk.bf16.mxu1 %vm483_vm1, %v2942_v39  ;;  %v3018_v39 = vrot.slane %v3016_v2, 1 }
 0x236   : > { %7277 = vmatmul.mubr.msk.bf16.gmra.mrb[40].mxu0 %vm483_vm1, %v5386_v20  ;;  %v3005_v50 = vsel %vm2727_vm3, %v2995_v11, %v3004_v41  ;;  %v3014_v54 = vsel %vm2727_vm3, %v3004_v41, %v3013_v19 }
 0x237   : > { %7280 = vmatprep.mubr.msk.bf16.mxu0 %vm483_vm1, %v5388_v42  ;;  %v3022_v20 = vor.u32 %v3021_v12, %v3018_v39 }
 0x239   : > { %v3023_v42 = vsel %vm2727_vm3, %v3013_v19, %v3022_v20 }
 0x23c   : > { %7017 = vmatmul.mubr.msk.bf16.gmra.mrb[44].mxu1 %vm483_vm1, %v2951_v29 }
 0x23d   : > { %7020 = vmatprep.mubr.msk.bf16.mxu1 %vm483_vm1, %v2960_v21 }
 0x23e   : > { %7281 = vmatmul.mubr.msk.bf16.gmra.mrb[44].mxu0 %vm483_vm1, %v5390_v57 }
 0x23f   : > { %7284 = vmatprep.mubr.msk.bf16.mxu0 %vm483_vm1, %v5392_v16 }
 0x244   : > { %7021 = vmatmul.mubr.msk.bf16.gmra.mrb[48].mxu1 %vm483_vm1, %v2969_v1 }
 0x245   : > { %7024 = vmatprep.mubr.msk.bf16.mxu1 %vm483_vm1, %v2978_v37 }
 0x246   : > { %7285 = vmatmul.mubr.msk.bf16.gmra.mrb[48].mxu0 %vm483_vm1, %v5394_v6 }
 0x247   : > { %7288 = vmatprep.mubr.msk.bf16.mxu0 %vm483_vm1, %v5396_v55 }
 0x24c   : > { %7025 = vmatmul.mubr.msk.bf16.gmra.mrb[52].mxu1 %vm483_vm1, %v2987_v28 }
 0x24d   : > { %7028 = vmatprep.mubr.msk.bf16.mxu1 %vm483_vm1, %v2996_v0 }
 0x24e   : > { %7289 = vmatmul.mubr.msk.bf16.gmra.mrb[52].mxu0 %vm483_vm1, %v5398_v24 }
 0x24f   : > { %7292 = vmatprep.mubr.msk.bf16.mxu0 %vm483_vm1, %v5400_v36 }
 0x254   : > { %7029 = vmatmul.mubr.msk.bf16.gmra.mrb[56].mxu1 %vm483_vm1, %v3005_v50 }
 0x255   : > { %7032 = vmatprep.mubr.msk.bf16.mxu1 %vm483_vm1, %v3014_v54 }
 0x256   : > { %7293 = vmatmul.mubr.msk.bf16.gmra.mrb[56].mxu0 %vm483_vm1, %v5402_v44 }
 0x257   : > { %7296 = vmatprep.mubr.msk.bf16.mxu0 %vm483_vm1, %v5404_v33 }
 0x25c   : > { %7033 = vmatmul.mubr.msk.bf16.gmra.mrb[60].mxu1 %vm483_vm1, %v3023_v42 }
 0x25e   : > { %7297 = vmatmul.mubr.msk.bf16.gmra.mrb[60].mxu0 %vm483_vm1, %v5406_v58 }
 0x277   : > { %v6908_v14 = vpop.f32.mrb[0].mxu1 }
 0x278   : > { %v2405_v30 = vpop.f32.mrb[1].mxu1 }
 0x279   : > { %v6909_v61 = vpop.f32.mrb[2].mxu1 }
 0x27a   : > { %v2408_v40 = vpop.f32.mrb[3].mxu1 }
 0x27f   : > { %v6912_v29 = vpop.f32.mrb[4].mxu1 }
 0x280   : > { %v2421_v51 = vpop.f32.mrb[5].mxu1 }
 0x281   : > { %v6913_v27 = vpop.f32.mrb[6].mxu1 }
 0x282   : > { %v2424_v49 = vpop.f32.mrb[7].mxu1 }
 0x287   : > { %v9345_v23 = vpop.f32.mrb[8].mxu1 }
 0x288   : > { %v9347_v21 = vpop.f32.mrb[9].mxu1 }
 0x289   : > { %v9349_v43 = vpop.f32.mrb[10].mxu1 }
 0x28a   : > { %v9351_v25 = vpop.f32.mrb[11].mxu1 }
 0x28f   : > { %v9353_v60 = vpop.f32.mrb[12].mxu1 }
 0x290   : > { %v9355_v57 = vpop.f32.mrb[13].mxu1 }
 0x291   : > { %v9357_v16 = vpop.f32.mrb[14].mxu1 }
 0x292   : > { %v9359_v62 = vpop.f32.mrb[15].mxu1 }
 0x297   : > { %v9361_v13 = vpop.f32.mrb[16].mxu1 }
 0x298   : > { %v9363_v63 = vpop.f32.mrb[17].mxu1 }
 0x299   : > { %v9365_v15 = vpop.f32.mrb[18].mxu1 }
 0x29a   : > { %v9367_v56 = vpop.f32.mrb[19].mxu1 }
 0x29f   : > { %v9369_v5 = vpop.f32.mrb[20].mxu1 }
 0x2a0   : > { %v9371_v1 = vpop.f32.mrb[21].mxu1 }
 0x2a1   : > { %v9373_v4 = vpop.f32.mrb[22].mxu1 }
 0x2a2   : > { %v9375_v47 = vpop.f32.mrb[23].mxu1 }
 0x2a7   : > { %v9377_v38 = vpop.f32.mrb[24].mxu1 }
 0x2a8   : > { %v9379_v35 = vpop.f32.mrb[25].mxu1 }
 0x2a9   : > { %v9381_v37 = vpop.f32.mrb[26].mxu1 }
 0x2aa   : > { %v9383_v31 = vpop.f32.mrb[27].mxu1 }
 0x2af   : > { %v9386_v45 = vpop.f32.mrb[28].mxu1 }
 0x2b0   : > { %v9388_v6 = vpop.f32.mrb[29].mxu1 }
 0x2b1   : > { %v9390_v55 = vpop.f32.mrb[30].mxu1 }
 0x2b2   : > { %v9392_v18 = vpop.f32.mrb[31].mxu1 }
 0x2b9   : > { %v7238_v11 = vpop.f32.mrb[0].mxu0 }
 0x2ba   : > { %v7302_v26 = vadd.f32 %v7238_v11, %v6908_v14  ;;  %v5540_v59 = vpop.f32.mrb[1].mxu0 }
 0x2bb   : > { %v7303_v3 = vadd.f32 %v5540_v59, %v2405_v30  ;;  %v7239_v28 = vpop.f32.mrb[2].mxu0 }
 0x2bc   : > { %v5868_v9 = vadd.f32 %v7302_v26, %v9397_v17  ;;  %v7304_v32 = vadd.f32 %v7239_v28, %v6909_v61  ;;  %v5543_v0 = vpop.f32.mrb[3].mxu0 }
 0x2bd   : > { %v5866_v34 = vadd.f32 %v7303_v3, %v9397_v17  ;;  %v7305_v7 = vadd.f32 %v5543_v0, %v2408_v40 }
 0x2be   : > { %5932 = vst [vmem:[%s9402_s29 + $0x10] sm:$0xff] %v5868_v9  ;;  %v5869_v8 = vadd.f32 %v7304_v32, %v9397_v17 }
 0x2bf   : > { %5930 = vst [vmem:[%s9402_s29] sm:$0xff] %v5866_v34  ;;  %v5867_v24 = vadd.f32 %v7305_v7, %v9397_v17 }
 0x2c0   : > { %5933 = vst [vmem:[%s9402_s29 + $0x18] sm:$0xff] %v5869_v8 }
 0x2c1   : > { %5931 = vst [vmem:[%s9402_s29 + $0x8] sm:$0xff] %v5867_v24  ;;  %v7242_v36 = vpop.f32.mrb[4].mxu0 }
 0x2c2   : > { %v7306_v41 = vadd.f32 %v7242_v36, %v6912_v29  ;;  %v5556_v46 = vpop.f32.mrb[5].mxu0 }
 0x2c3   : > { %v7307_v2 = vadd.f32 %v5556_v46, %v2421_v51  ;;  %v7243_v22 = vpop.f32.mrb[6].mxu0 }
 0x2c4   : > { %v5872_v19 = vadd.f32 %v7306_v41, %v9397_v17  ;;  %v7308_v10 = vadd.f32 %v7243_v22, %v6913_v27  ;;  %v5559_v48 = vpop.f32.mrb[7].mxu0 }
 0x2c5   : > { %v5870_v53 = vadd.f32 %v7307_v2, %v9397_v17  ;;  %v7309_v50 = vadd.f32 %v5559_v48, %v2424_v49 }
 0x2c6   : > { %5936 = vst [vmem:[%s9402_s29 + $0x30] sm:$0xff] %v5872_v19  ;;  %v5873_v39 = vadd.f32 %v7308_v10, %v9397_v17 }
 0x2c7   : > { %5934 = vst [vmem:[%s9402_s29 + $0x20] sm:$0xff] %v5870_v53  ;;  %v5871_v12 = vadd.f32 %v7309_v50, %v9397_v17 }
 0x2c8   : > { %5937 = vst [vmem:[%s9402_s29 + $0x38] sm:$0xff] %v5873_v39 }
 0x2c9   : > { %5935 = vst [vmem:[%s9402_s29 + $0x28] sm:$0xff] %v5871_v12  ;;  %v7246_v54 = vpop.f32.mrb[8].mxu0 }
 0x2ca   : > { %v7310_v44 = vadd.f32 %v7246_v54, %v9345_v23  ;;  %v5572_v33 = vpop.f32.mrb[9].mxu0 }
 0x2cb   : > { %v7311_v20 = vadd.f32 %v5572_v33, %v9347_v21  ;;  %v7247_v52 = vpop.f32.mrb[10].mxu0 }
 0x2cc   : > { %v5876_v42 = vadd.f32 %v7310_v44, %v9397_v17  ;;  %v7312_v58 = vadd.f32 %v7247_v52, %v9349_v43  ;;  %v5575_v14 = vpop.f32.mrb[11].mxu0 }
 0x2cd   : > { %v5874_v30 = vadd.f32 %v7311_v20, %v9397_v17  ;;  %v7313_v61 = vadd.f32 %v5575_v14, %v9351_v25 }
 0x2ce   : > { %5940 = vst [vmem:[%s9402_s29 + $0x50] sm:$0xff] %v5876_v42  ;;  %v5877_v40 = vadd.f32 %v7312_v58, %v9397_v17 }
 0x2cf   : > { %5938 = vst [vmem:[%s9402_s29 + $0x40] sm:$0xff] %v5874_v30  ;;  %v5875_v29 = vadd.f32 %v7313_v61, %v9397_v17 }
 0x2d0   : > { %5941 = vst [vmem:[%s9402_s29 + $0x58] sm:$0xff] %v5877_v40 }
 0x2d1   : > { %5939 = vst [vmem:[%s9402_s29 + $0x48] sm:$0xff] %v5875_v29  ;;  %v7250_v51 = vpop.f32.mrb[12].mxu0 }
 0x2d2   : > { %v7314_v27 = vadd.f32 %v7250_v51, %v9353_v60  ;;  %v5588_v49 = vpop.f32.mrb[13].mxu0 }
 0x2d3   : > { %v7315_v23 = vadd.f32 %v5588_v49, %v9355_v57  ;;  %v7251_v21 = vpop.f32.mrb[14].mxu0 }
 0x2d4   : > { %v5880_v43 = vadd.f32 %v7314_v27, %v9397_v17  ;;  %v7316_v25 = vadd.f32 %v7251_v21, %v9357_v16  ;;  %v5591_v11 = vpop.f32.mrb[15].mxu0 }
 0x2d5   : > { %v5878_v26 = vadd.f32 %v7315_v23, %v9397_v17  ;;  %v7317_v59 = vadd.f32 %v5591_v11, %v9359_v62 }
 0x2d6   : > { %5944 = vst [vmem:[%s9402_s29 + $0x70] sm:$0xff] %v5880_v43  ;;  %v5881_v3 = vadd.f32 %v7316_v25, %v9397_v17 }
 0x2d7   : > { %5942 = vst [vmem:[%s9402_s29 + $0x60] sm:$0xff] %v5878_v26  ;;  %v5879_v60 = vadd.f32 %v7317_v59, %v9397_v17 }
 0x2d8   : > { %5945 = vst [vmem:[%s9402_s29 + $0x78] sm:$0xff] %v5881_v3 }
 0x2d9   : > { %5943 = vst [vmem:[%s9402_s29 + $0x68] sm:$0xff] %v5879_v60  ;;  %v7254_v57 = vpop.f32.mrb[16].mxu0 }
 0x2da   : > { %v7318_v16 = vadd.f32 %v7254_v57, %v9361_v13  ;;  %v5604_v28 = vpop.f32.mrb[17].mxu0 }
 0x2db   : > { %v7319_v9 = vadd.f32 %v5604_v28, %v9363_v63  ;;  %v7255_v32 = vpop.f32.mrb[18].mxu0 }
 0x2dc   : > { %v5884_v62 = vadd.f32 %v7318_v16, %v9397_v17  ;;  %v7320_v0 = vadd.f32 %v7255_v32, %v9365_v15  ;;  %v5607_v34 = vpop.f32.mrb[19].mxu0 }
 0x2dd   : > { %v5882_v7 = vadd.f32 %v7319_v9, %v9397_v17  ;;  %v7321_v8 = vadd.f32 %v5607_v34, %v9367_v56 }
 0x2de   : > { %5948 = vst [vmem:[%s9402_s29 + $0x90] sm:$0xff] %v5884_v62  ;;  %v5885_v24 = vadd.f32 %v7320_v0, %v9397_v17 }
 0x2df   : > { %5946 = vst [vmem:[%s9402_s29 + $0x80] sm:$0xff] %v5882_v7  ;;  %v5883_v13 = vadd.f32 %v7321_v8, %v9397_v17 }
 0x2e0   : > { %5949 = vst [vmem:[%s9402_s29 + $0x98] sm:$0xff] %v5885_v24 }
 0x2e1   : > { %5947 = vst [vmem:[%s9402_s29 + $0x88] sm:$0xff] %v5883_v13  ;;  %v7258_v63 = vpop.f32.mrb[20].mxu0 }
 0x2e2   : > { %v7322_v15 = vadd.f32 %v7258_v63, %v9369_v5  ;;  %v5620_v36 = vpop.f32.mrb[21].mxu0 }
 0x2e3   : > { %v7323_v41 = vadd.f32 %v5620_v36, %v9371_v1  ;;  %v7259_v46 = vpop.f32.mrb[22].mxu0 }
 0x2e4   : > { %v5888_v56 = vadd.f32 %v7322_v15, %v9397_v17  ;;  %v7324_v2 = vadd.f32 %v7259_v46, %v9373_v4  ;;  %v5623_v22 = vpop.f32.mrb[23].mxu0 }
 0x2e5   : > { %v5886_v19 = vadd.f32 %v7323_v41, %v9397_v17  ;;  %v7325_v10 = vadd.f32 %v5623_v22, %v9375_v47 }
 0x2e6   : > { %5952 = vst [vmem:[%s9402_s29 + $0xb0] sm:$0xff] %v5888_v56  ;;  %v5889_v48 = vadd.f32 %v7324_v2, %v9397_v17 }
 0x2e7   : > { %5950 = vst [vmem:[%s9402_s29 + $0xa0] sm:$0xff] %v5886_v19  ;;  %v5887_v5 = vadd.f32 %v7325_v10, %v9397_v17 }
 0x2e8   : > { %5953 = vst [vmem:[%s9402_s29 + $0xb8] sm:$0xff] %v5889_v48 }
 0x2e9   : > { %5951 = vst [vmem:[%s9402_s29 + $0xa8] sm:$0xff] %v5887_v5  ;;  %v7262_v1 = vpop.f32.mrb[24].mxu0 }
 0x2ea   : > { %v7326_v4 = vadd.f32 %v7262_v1, %v9377_v38  ;;  %v5636_v53 = vpop.f32.mrb[25].mxu0 }
 0x2eb   : > { %v7327_v50 = vadd.f32 %v5636_v53, %v9379_v35  ;;  %v7263_v39 = vpop.f32.mrb[26].mxu0 }
 0x2ec   : > { %v5892_v47 = vadd.f32 %v7326_v4, %v9397_v17  ;;  %v7328_v12 = vadd.f32 %v7263_v39, %v9381_v37  ;;  %v5639_v54 = vpop.f32.mrb[27].mxu0 }
 0x2ed   : > { %v5890_v44 = vadd.f32 %v7327_v50, %v9397_v17  ;;  %v7329_v33 = vadd.f32 %v5639_v54, %v9383_v31 }
 0x2ee   : > { %5956 = vst [vmem:[%s9402_s29 + $0xd0] sm:$0xff] %v5892_v47  ;;  %v5893_v20 = vadd.f32 %v7328_v12, %v9397_v17 }
 0x2ef   : > { %5954 = vst [vmem:[%s9402_s29 + $0xc0] sm:$0xff] %v5890_v44  ;;  %v5891_v38 = vadd.f32 %v7329_v33, %v9397_v17 }
 0x2f0   : > { %5957 = vst [vmem:[%s9402_s29 + $0xd8] sm:$0xff] %v5893_v20 }
 0x2f1   : > { %5955 = vst [vmem:[%s9402_s29 + $0xc8] sm:$0xff] %v5891_v38  ;;  %v7266_v35 = vpop.f32.mrb[28].mxu0 }
 0x2f2   : > { %v7330_v52 = vadd.f32 %v7266_v35, %v9386_v45  ;;  %v5652_v37 = vpop.f32.mrb[29].mxu0 }
 0x2f3   : > { %v7331_v42 = vadd.f32 %v5652_v37, %v9388_v6  ;;  %v7267_v58 = vpop.f32.mrb[30].mxu0 }
 0x2f4   : > { %v5896_v31 = vadd.f32 %v7330_v52, %v9397_v17  ;;  %v7332_v14 = vadd.f32 %v7267_v58, %v9390_v55  ;;  %v5655_v30 = vpop.f32.mrb[31].mxu0 }
 0x2f5   : > { %v5894_v61 = vadd.f32 %v7331_v42, %v9397_v17  ;;  %v7333_v40 = vadd.f32 %v5655_v30, %v9392_v18 }
 0x2f6   : > { %5960 = vst [vmem:[%s9402_s29 + $0xf0] sm:$0xff] %v5896_v31  ;;  %v5897_v29 = vadd.f32 %v7332_v14, %v9397_v17 }
 0x2f7   : > { %5958 = vst [vmem:[%s9402_s29 + $0xe0] sm:$0xff] %v5894_v61  ;;  %v5895_v45 = vadd.f32 %v7333_v40, %v9397_v17  ;;  %v7006_v51 = vpop.f32.mrb[32].mxu1 }
 0x2f8   : > { %5961 = vst [vmem:[%s9402_s29 + $0xf8] sm:$0xff] %v5897_v29  ;;  %v3285_v6 = vpop.f32.mrb[33].mxu1 }
 0x2f9   : > { %5959 = vst [vmem:[%s9402_s29 + $0xe8] sm:$0xff] %v5895_v45  ;;  %v7270_v27 = vpop.f32.mrb[32].mxu0  ;;  %v7007_v49 = vpop.f32.mrb[34].mxu1 }
 0x2fa   : > { %v7334_v55 = vadd.f32 %v7270_v27, %v7006_v51  ;;  %v5668_v23 = vpop.f32.mrb[33].mxu0  ;;  %v3288_v21 = vpop.f32.mrb[35].mxu1 }
 0x2fb   : > { %v7335_v18 = vadd.f32 %v5668_v23, %v3285_v6  ;;  %v7271_v43 = vpop.f32.mrb[34].mxu0 }
 0x2fc   : > { %v5900_v25 = vadd.f32 %v7334_v55, %v9397_v17  ;;  %v7336_v11 = vadd.f32 %v7271_v43, %v7007_v49  ;;  %v5671_v26 = vpop.f32.mrb[35].mxu0 }
 0x2fd   : > { %v5898_v59 = vadd.f32 %v7335_v18, %v9397_v17  ;;  %v7337_v3 = vadd.f32 %v5671_v26, %v3288_v21 }
 0x2fe   : > { %5964 = vst [vmem:[%s9402_s29 + $0x110] sm:$0xff] %v5900_v25  ;;  %v5901_v60 = vadd.f32 %v7336_v11, %v9397_v17 }
 0x2ff   : > { %5962 = vst [vmem:[%s9402_s29 + $0x100] sm:$0xff] %v5898_v59  ;;  %v5899_v57 = vadd.f32 %v7337_v3, %v9397_v17  ;;  %v7010_v16 = vpop.f32.mrb[36].mxu1 }
 0x300   : > { %5965 = vst [vmem:[%s9402_s29 + $0x118] sm:$0xff] %v5901_v60  ;;  %v3301_v28 = vpop.f32.mrb[37].mxu1 }
 0x301   : > { %5963 = vst [vmem:[%s9402_s29 + $0x108] sm:$0xff] %v5899_v57  ;;  %v7274_v9 = vpop.f32.mrb[36].mxu0  ;;  %v7011_v32 = vpop.f32.mrb[38].mxu1 }
 0x302   : > { %v7338_v62 = vadd.f32 %v7274_v9, %v7010_v16  ;;  %v5684_v0 = vpop.f32.mrb[37].mxu0  ;;  %v3304_v34 = vpop.f32.mrb[39].mxu1 }
 0x303   : > { %v7339_v7 = vadd.f32 %v5684_v0, %v3301_v28  ;;  %v7275_v8 = vpop.f32.mrb[38].mxu0 }
 0x304   : > { %v5904_v24 = vadd.f32 %v7338_v62, %v9397_v17  ;;  %v7340_v13 = vadd.f32 %v7275_v8, %v7011_v32  ;;  %v5687_v63 = vpop.f32.mrb[39].mxu0 }
 0x305   : > { %v5902_v15 = vadd.f32 %v7339_v7, %v9397_v17  ;;  %v7341_v36 = vadd.f32 %v5687_v63, %v3304_v34 }
 0x306   : > { %5968 = vst [vmem:[%s9402_s29 + $0x130] sm:$0xff] %v5904_v24  ;;  %v5905_v41 = vadd.f32 %v7340_v13, %v9397_v17 }
 0x307   : > { %5966 = vst [vmem:[%s9402_s29 + $0x120] sm:$0xff] %v5902_v15  ;;  %v5903_v46 = vadd.f32 %v7341_v36, %v9397_v17  ;;  %v7014_v56 = vpop.f32.mrb[40].mxu1 }
 0x308   : > { %5969 = vst [vmem:[%s9402_s29 + $0x138] sm:$0xff] %v5905_v41  ;;  %v3317_v2 = vpop.f32.mrb[41].mxu1 }
 0x309   : > { %5967 = vst [vmem:[%s9402_s29 + $0x128] sm:$0xff] %v5903_v46  ;;  %v7278_v22 = vpop.f32.mrb[40].mxu0  ;;  %v7015_v19 = vpop.f32.mrb[42].mxu1 }
 0x30a   : > { %v7342_v10 = vadd.f32 %v7278_v22, %v7014_v56  ;;  %v5700_v48 = vpop.f32.mrb[41].mxu0  ;;  %v3320_v5 = vpop.f32.mrb[43].mxu1 }
 0x30b   : > { %v7343_v1 = vadd.f32 %v5700_v48, %v3317_v2  ;;  %v7279_v4 = vpop.f32.mrb[42].mxu0 }
 0x30c   : > { %v5908_v53 = vadd.f32 %v7342_v10, %v9397_v17  ;;  %v7344_v50 = vadd.f32 %v7279_v4, %v7015_v19  ;;  %v5703_v39 = vpop.f32.mrb[43].mxu0 }
 0x30d   : > { %v5906_v47 = vadd.f32 %v7343_v1, %v9397_v17  ;;  %v7345_v12 = vadd.f32 %v5703_v39, %v3320_v5 }
 0x30e   : > { %5972 = vst [vmem:[%s9402_s29 + $0x150] sm:$0xff] %v5908_v53  ;;  %v5909_v54 = vadd.f32 %v7344_v50, %v9397_v17 }
 0x30f   : > { %5970 = vst [vmem:[%s9402_s29 + $0x140] sm:$0xff] %v5906_v47  ;;  %v5907_v44 = vadd.f32 %v7345_v12, %v9397_v17  ;;  %v7018_v33 = vpop.f32.mrb[44].mxu1 }
 0x310   : > { %5973 = vst [vmem:[%s9402_s29 + $0x158] sm:$0xff] %v5909_v54  ;;  %v3333_v20 = vpop.f32.mrb[45].mxu1 }
 0x311   : > { %5971 = vst [vmem:[%s9402_s29 + $0x148] sm:$0xff] %v5907_v44  ;;  %v7282_v38 = vpop.f32.mrb[44].mxu0  ;;  %v7019_v35 = vpop.f32.mrb[46].mxu1 }
 0x312   : > { %v7346_v52 = vadd.f32 %v7282_v38, %v7018_v33  ;;  %v5716_v37 = vpop.f32.mrb[45].mxu0  ;;  %v3336_v42 = vpop.f32.mrb[47].mxu1 }
 0x313   : > { %v7347_v58 = vadd.f32 %v5716_v37, %v3333_v20  ;;  %v7283_v31 = vpop.f32.mrb[46].mxu0 }
 0x314   : > { %v5912_v14 = vadd.f32 %v7346_v52, %v9397_v17  ;;  %v7348_v30 = vadd.f32 %v7283_v31, %v7019_v35  ;;  %v5719_v61 = vpop.f32.mrb[47].mxu0 }
 0x315   : > { %v5910_v40 = vadd.f32 %v7347_v58, %v9397_v17  ;;  %v7349_v29 = vadd.f32 %v5719_v61, %v3336_v42 }
 0x316   : > { %5976 = vst [vmem:[%s9402_s29 + $0x170] sm:$0xff] %v5912_v14  ;;  %v5913_v45 = vadd.f32 %v7348_v30, %v9397_v17 }
 0x317   : > { %5974 = vst [vmem:[%s9402_s29 + $0x160] sm:$0xff] %v5910_v40  ;;  %v5911_v51 = vadd.f32 %v7349_v29, %v9397_v17  ;;  %v7022_v6 = vpop.f32.mrb[48].mxu1 }
 0x318   : > { %5977 = vst [vmem:[%s9402_s29 + $0x178] sm:$0xff] %v5913_v45  ;;  %v3349_v27 = vpop.f32.mrb[49].mxu1 }
 0x319   : > { %5975 = vst [vmem:[%s9402_s29 + $0x168] sm:$0xff] %v5911_v51  ;;  %v7286_v49 = vpop.f32.mrb[48].mxu0  ;;  %v7023_v55 = vpop.f32.mrb[50].mxu1 }
 0x31a   : > { %v7350_v23 = vadd.f32 %v7286_v49, %v7022_v6  ;;  %v5732_v21 = vpop.f32.mrb[49].mxu0  ;;  %v3352_v18 = vpop.f32.mrb[51].mxu1 }
 0x31b   : > { %v7351_v43 = vadd.f32 %v5732_v21, %v3349_v27  ;;  %v7287_v25 = vpop.f32.mrb[50].mxu0 }
 0x31c   : > { %v5916_v11 = vadd.f32 %v7350_v23, %v9397_v17  ;;  %v7352_v26 = vadd.f32 %v7287_v25, %v7023_v55  ;;  %v5735_v59 = vpop.f32.mrb[51].mxu0 }
 0x31d   : > { %v5914_v3 = vadd.f32 %v7351_v43, %v9397_v17  ;;  %v7353_v60 = vadd.f32 %v5735_v59, %v3352_v18 }
 0x31e   : > { %5980 = vst [vmem:[%s9402_s29 + $0x190] sm:$0xff] %v5916_v11  ;;  %v5917_v57 = vadd.f32 %v7352_v26, %v9397_v17 }
 0x31f   : > { %5978 = vst [vmem:[%s9402_s29 + $0x180] sm:$0xff] %v5914_v3  ;;  %v5915_v16 = vadd.f32 %v7353_v60, %v9397_v17  ;;  %v7026_v28 = vpop.f32.mrb[52].mxu1 }
 0x320   : > { %5981 = vst [vmem:[%s9402_s29 + $0x198] sm:$0xff] %v5917_v57  ;;  %v3365_v9 = vpop.f32.mrb[53].mxu1 }
 0x321   : > { %5979 = vst [vmem:[%s9402_s29 + $0x188] sm:$0xff] %v5915_v16  ;;  %v7290_v32 = vpop.f32.mrb[52].mxu0  ;;  %v7027_v62 = vpop.f32.mrb[54].mxu1 }
 0x322   : > { %v7354_v0 = vadd.f32 %v7290_v32, %v7026_v28  ;;  %v5748_v34 = vpop.f32.mrb[53].mxu0  ;;  %v3368_v7 = vpop.f32.mrb[55].mxu1 }
 0x323   : > { %v7355_v8 = vadd.f32 %v5748_v34, %v3365_v9  ;;  %v7291_v24 = vpop.f32.mrb[54].mxu0 }
 0x324   : > { %v5920_v13 = vadd.f32 %v7354_v0, %v9397_v17  ;;  %v7356_v63 = vadd.f32 %v7291_v24, %v7027_v62  ;;  %v5751_v15 = vpop.f32.mrb[55].mxu0 }
 0x325   : > { %v5918_v36 = vadd.f32 %v7355_v8, %v9397_v17  ;;  %v7357_v41 = vadd.f32 %v5751_v15, %v3368_v7 }
 0x326   : > { %5984 = vst [vmem:[%s9402_s29 + $0x1b0] sm:$0xff] %v5920_v13  ;;  %v5921_v46 = vadd.f32 %v7356_v63, %v9397_v17 }
 0x327   : > { %5982 = vst [vmem:[%s9402_s29 + $0x1a0] sm:$0xff] %v5918_v36  ;;  %v5919_v56 = vadd.f32 %v7357_v41, %v9397_v17  ;;  %v7030_v2 = vpop.f32.mrb[56].mxu1 }
 0x328   : > { %5985 = vst [vmem:[%s9402_s29 + $0x1b8] sm:$0xff] %v5921_v46  ;;  %v3381_v22 = vpop.f32.mrb[57].mxu1 }
 0x329   : > { %5983 = vst [vmem:[%s9402_s29 + $0x1a8] sm:$0xff] %v5919_v56  ;;  %v7294_v19 = vpop.f32.mrb[56].mxu0  ;;  %v7031_v10 = vpop.f32.mrb[58].mxu1 }
 0x32a   : > { %v7358_v48 = vadd.f32 %v7294_v19, %v7030_v2  ;;  %v5764_v5 = vpop.f32.mrb[57].mxu0  ;;  %v3384_v1 = vpop.f32.mrb[59].mxu1 }
 0x32b   : > { %v7359_v4 = vadd.f32 %v5764_v5, %v3381_v22  ;;  %v7295_v53 = vpop.f32.mrb[58].mxu0 }
 0x32c   : > { %v5924_v50 = vadd.f32 %v7358_v48, %v9397_v17  ;;  %v7360_v39 = vadd.f32 %v7295_v53, %v7031_v10  ;;  %v5767_v47 = vpop.f32.mrb[59].mxu0 }
 0x32d   : > { %v5922_v12 = vadd.f32 %v7359_v4, %v9397_v17  ;;  %v7361_v54 = vadd.f32 %v5767_v47, %v3384_v1 }
 0x32e   : > { %5988 = vst [vmem:[%s9402_s29 + $0x1d0] sm:$0xff] %v5924_v50  ;;  %v5925_v44 = vadd.f32 %v7360_v39, %v9397_v17 }
 0x32f   : > { %5986 = vst [vmem:[%s9402_s29 + $0x1c0] sm:$0xff] %v5922_v12  ;;  %v5923_v33 = vadd.f32 %v7361_v54, %v9397_v17  ;;  %v7034_v20 = vpop.f32.mrb[60].mxu1 }
 0x330   : > { %5989 = vst [vmem:[%s9402_s29 + $0x1d8] sm:$0xff] %v5925_v44  ;;  %v3397_v38 = vpop.f32.mrb[61].mxu1 }
 0x331   : > { %5987 = vst [vmem:[%s9402_s29 + $0x1c8] sm:$0xff] %v5923_v33  ;;  %v7298_v35 = vpop.f32.mrb[60].mxu0  ;;  %v7035_v52 = vpop.f32.mrb[62].mxu1 }
 0x332   : > { %v7362_v37 = vadd.f32 %v7298_v35, %v7034_v20  ;;  %v5780_v42 = vpop.f32.mrb[61].mxu0  ;;  %v3400_v58 = vpop.f32.mrb[63].mxu1 }
 0x333   : > { %v7363_v31 = vadd.f32 %v5780_v42, %v3397_v38  ;;  %v7299_v14 = vpop.f32.mrb[62].mxu0 }
 0x334   : > { %v5928_v30 = vadd.f32 %v7362_v37, %v9397_v17  ;;  %v7364_v61 = vadd.f32 %v7299_v14, %v7035_v52  ;;  %v5783_v40 = vpop.f32.mrb[63].mxu0 }
 0x335   : > { %v5926_v29 = vadd.f32 %v7363_v31, %v9397_v17  ;;  %v7365_v45 = vadd.f32 %v5783_v40, %v3400_v58 }
 0x336   : > { %5992 = vst [vmem:[%s9402_s29 + $0x1f0] sm:$0xff] %v5928_v30  ;;  %v5929_v51 = vadd.f32 %v7364_v61, %v9397_v17 }
 0x337   : > { %5990 = vst [vmem:[%s9402_s29 + $0x1e0] sm:$0xff] %v5926_v29  ;;  %v5927_v6 = vadd.f32 %v7365_v45, %v9397_v17 }
 0x338   : > { %5993 = vst [vmem:[%s9402_s29 + $0x1f8] sm:$0xff] %v5929_v51 }
 0x339   : > { %5991 = vst [vmem:[%s9402_s29 + $0x1e8] sm:$0xff] %v5927_v6 }
 0x33a PF: > { %s14_s15 = sadd.s32 1, %s7908_s15  }
 0x33b   : > { %p11_p6 = scmp.ge.s32.totalorder %s14_s15, 4  }
 0x33d   :  { %13 = sbr.rel (!%p11_p6) target bundleno = 1 (0x1), region = 77 }

</bundles_post_ra>
